<compile_context>
chip_gen: v7x
topology: tpu7x:2x2x1
jax: 0.10.0
libtpu: 0.0.40
codegen_flags: <defaults>
</compile_context>

<pallas_src>
import jax
import jax.numpy as jnp
import numpy as np
from jax.experimental import pallas as pl
from jax.experimental.pallas import tpu as pltpu

EPS = 1e-5             # nn.InstanceNorm2d default eps
SOFTGATE_COEFF = 12.0  # SoftGate.COEFF


# ---------------------------------------------------------------------------
# in-kernel helper: 3x3 conv (im2col matmul) fused with InstanceNorm (+ReLU)
# ---------------------------------------------------------------------------
def _conv3x3_in(x, w, cm, img_w, patch_ref, gamma=None, beta=None, relu=False):
    """3x3 / stride-1 / pad-1 conv (no bias) as a single im2col matmul, fused
    with InstanceNorm2d (one-pass stats) and optional affine / ReLU.

    x:         (Cin, H*W) f32 value, channel-major, spatial flattened on lanes
    w:         (Cout, 9*Cin) bf16 value, packed as w[o, (3*dy+dx)*Cin + c]
    cm:        (2, H*W) f32 column masks: cm[0] = (col >= 1), cm[1] = (col <= W-2)
    img_w:     static image width W
    patch_ref: (9*Cin, H*W) f32 VMEM scratch holding the im2col matrix
    returns    (Cout, H*W) f32
    """
    cin, hw = x.shape
    mask_l = cm[0:1, :]
    mask_r = cm[1:2, :]

    # Assemble the im2col matrix.  Tap k = 3*dy + dx reads x shifted by
    # d = (dy-1)*W + (dx-1) along the flattened spatial axis; the zero tails of
    # the scratch provide the conv zero-padding and the column masks kill
    # positions that would wrap across image rows.
    patch_ref[...] = jnp.zeros_like(patch_ref)
    for k in range(9):
        sy, sx = k // 3 - 1, k % 3 - 1
        d = sy * img_w + sx
        m = mask_l if sx < 0 else (mask_r if sx > 0 else None)
        r0 = k * cin
        if d > 0:
            v = x[:, d:]
            if m is not None:
                v = v * m[:, 0:hw - d]
            patch_ref[r0:r0 + cin, 0:hw - d] = v
        elif d < 0:
            v = x[:, 0:hw + d]
            if m is not None:
                v = v * m[:, (-d):hw]
            patch_ref[r0:r0 + cin, (-d):hw] = v
        else:
            patch_ref[r0:r0 + cin, :] = x

    # Single MXU matmul: bf16 operands, f32 accumulation.
    patches = patch_ref[...].astype(jnp.bfloat16)
    acc = jnp.dot(w, patches, preferred_element_type=jnp.float32)   # (Cout, HW)

    # InstanceNorm2d over the spatial (lane) axis, one-pass statistics.
    inv_n = 1.0 / hw
    mean = jnp.sum(acc, axis=1, keepdims=True) * inv_n
    msq = jnp.sum(acc * acc, axis=1, keepdims=True) * inv_n
    var = jnp.maximum(msq - mean * mean, 0.0)
    y = (acc - mean) * jax.lax.rsqrt(var + EPS)
    if gamma is not None:          # affine=True InstanceNorm (logit branch)
        y = y * gamma + beta
    if relu:
        y = jnp.maximum(y, 0.0)
    return y


# ---------------------------------------------------------------------------
# fused whole-encoder kernel (one batch element per grid step)
# ---------------------------------------------------------------------------
def _make_encoder_kernel(n_2xdown, sizes):
    n_sizes = n_2xdown + 1
    num_in = 1 + n_sizes + 1 + 5 * n_2xdown

    def kernel(*refs):
        in_refs = refs[:num_in]
        out_ref = refs[num_in]
        scratch = refs[num_in + 1:]

        x_ref = in_refs[0]
        cm = [in_refs[1 + i][...] for i in range(n_sizes)]
        w0 = in_refs[1 + n_sizes][...]
        stage_refs = in_refs[2 + n_sizes:]

        # Conv3x3(semantic_nc -> ngf, no bias) + IN(affine=False) + ReLU
        h = _conv3x3_in(x_ref[0], w0, cm[0], sizes[0][1], scratch[0], relu=True)

        for i in range(n_2xdown):
            lw, lg, lb, pmat, dw = (r[...] for r in stage_refs[5 * i:5 * i + 5])
            w_in = sizes[i][1]
            w_out = sizes[i + 1][1]

            # SimplifiedLIP logit: Conv3x3(no bias) + IN(affine=True) + SoftGate
            y = _conv3x3_in(h, lw, cm[i], w_in, scratch[1 + 2 * i],
                            gamma=lg, beta=lb)
            sig = 1.0 / (1.0 + jnp.exp(-y))            # f32 on VPU/EUP
            wt = jnp.exp(SOFTGATE_COEFF * sig)         # exp(SoftGate(logit)), f32
            xw = h * wt

            # lip2d: ratio of 3x3 / stride-2 / pad-1 sum pools (divisors cancel)
            num = jnp.dot(xw, pmat, preferred_element_type=jnp.float32)
            den = jnp.dot(wt, pmat, preferred_element_type=jnp.float32)
            h = num * pl.reciprocal(den, approx=True)

            # Conv3x3(C -> C', bias dropped: cancelled by affine=False IN) + IN (+ReLU)
            h = _conv3x3_in(h, dw, cm[i + 1], w_out, scratch[2 + 2 * i],
                            relu=(i < n_2xdown - 1))

        out_ref[0] = h

    return kernel


# ---------------------------------------------------------------------------
# host-side helpers (tiny constant tables + weight packing)
# ---------------------------------------------------------------------------
def _make_pool_matrix(H, W):
    """0/1 matrix (H*W, Ho*Wo): column (i, j) selects the 3x3 window centered
    at input (2i, 2j) (kernel=3, stride=2, padding=1, zero pad).

    # TODO(synk): this dense matrix is O(H*W*Ho*Wo); replace with in-kernel
    # shifted adds + stride-2 subsample before scaling to real resolutions.
    """
    Ho, Wo = (H - 1) // 2 + 1, (W - 1) // 2 + 1
    P = np.zeros((H * W, Ho * Wo), np.float32)
    for i in range(Ho):
        for j in range(Wo):
            for dy in (-1, 0, 1):
                for dx in (-1, 0, 1):
                    p, q = 2 * i + dy, 2 * j + dx
                    if 0 <= p < H and 0 <= q < W:
                        P[p * W + q, i * Wo + j] = 1.0
    return jnp.asarray(P), Ho, Wo


def _make_col_masks(H, W):
    """(2, H*W) f32 column-validity masks: row0 = (col >= 1), row1 = (col <= W-2)."""
    col = np.arange(H * W, dtype=np.int64) % W
    cm = np.stack([col >= 1, col <= W - 2]).astype(np.float32)
    return jnp.asarray(cm)


def _pack_conv_weight(w_oihw):
    """torch Conv2d weight (Cout, Cin, 3, 3) -> (Cout, 9*Cin) with row order
    (3*dy + dx)*Cin + c, matching the in-kernel im2col layout."""
    cout, cin, kh, kw = w_oihw.shape
    return jnp.transpose(w_oihw, (0, 2, 3, 1)).reshape(cout, kh * kw * cin)


# ---------------------------------------------------------------------------
# LIPEncoder forward + deterministic parameter init
# ---------------------------------------------------------------------------
def lip_encoder_forward(x_nchw, params, n_2xdown):
    """x_nchw: (N, C, H, W) f32 -> (N, C_out, H >> n_2xdown, W >> n_2xdown) f32."""
    N, C0, H, W = x_nchw.shape

    sizes = [(H, W)]
    for _ in range(n_2xdown):
        ph, pw = sizes[-1]
        sizes.append(((ph - 1) // 2 + 1, (pw - 1) // 2 + 1))

    colmasks = [_make_col_masks(ph, pw) for (ph, pw) in sizes]
    pools = [_make_pool_matrix(*sizes[i])[0] for i in range(n_2xdown)]

    inputs = [x_nchw.reshape(N, C0, H * W)] + colmasks + [params["conv0_w"]]
    scratch_shapes = [pltpu.VMEM((9 * C0, H * W), jnp.float32)]
    for i in range(n_2xdown):
        st = params["stages"][i]
        inputs += [st["logit_w"], st["logit_g"], st["logit_be"], pools[i], st["down_w"]]
        cin = st["logit_w"].shape[0]
        scratch_shapes.append(
            pltpu.VMEM((9 * cin, sizes[i][0] * sizes[i][1]), jnp.float32))
        scratch_shapes.append(
            pltpu.VMEM((9 * cin, sizes[i + 1][0] * sizes[i + 1][1]), jnp.float32))

    c_last = (params["stages"][-1]["down_w"].shape[0]
              if n_2xdown else params["conv0_w"].shape[0])
    Hl, Wl = sizes[-1]

    in_specs = [pl.BlockSpec((1, C0, H * W), lambda n: (n, 0, 0))]
    for a in inputs[1:]:
        in_specs.append(pl.BlockSpec(a.shape, lambda n, r=a.ndim: (0,) * r))

    # TODO(synk): for real HiFaceGAN resolutions, tile the spatial axis in the
    # BlockSpecs (row blocks with a 1-row halo) and set vmem_limit_bytes;
    # whole-image blocks are fine at these toy sizes.
    out_flat = pl.pallas_call(
        _make_encoder_kernel(n_2xdown, sizes),
        grid=(N,),
        in_specs=in_specs,
        out_specs=pl.BlockSpec((1, c_last, Hl * Wl), lambda n: (n, 0, 0)),
        out_shape=jax.ShapeDtypeStruct((N, c_last, Hl * Wl), jnp.float32),
        scratch_shapes=scratch_shapes,
        compiler_params=pltpu.CompilerParams(
            dimension_semantics=("parallel",)),
    )(*inputs)
    return out_flat.reshape(N, c_last, Hl, Wl)


def init_params(key, semantic_nc, ngf, n_2xdown, max_ratio=16):
    ks = iter(jax.random.split(key, 2 + 4 * n_2xdown))

    def nrm(shape, scale=0.1):
        return scale * jax.random.normal(next(ks), shape, jnp.float32)

    params = {
        # Conv2d(semantic_nc, ngf, 3, padding=1, bias=False); following
        # InstanceNorm2d(ngf) is affine=False -> no gamma/beta needed.
        "conv0_w": _pack_conv_weight(nrm((ngf, semantic_nc, 3, 3))).astype(jnp.bfloat16),
        "stages": [],
    }
    cur = 1
    for _ in range(n_2xdown):
        nxt = min(cur * 2, max_ratio)
        cin, cout = ngf * cur, ngf * nxt
        params["stages"].append({
            # SimplifiedLIP.logit = Conv2d(C,C,3,bias=False) + IN(affine=True) + SoftGate
            "logit_w": _pack_conv_weight(nrm((cin, cin, 3, 3))).astype(jnp.bfloat16),
            "logit_g": (1.0 + nrm((cin, 1))).astype(jnp.float32),
            "logit_be": nrm((cin, 1)).astype(jnp.float32),
            # Conv2d(cin, cout, 3, padding=1, bias=True) + IN(affine=False): the bias is
            # exactly cancelled by the mean subtraction -> dead compute, dropped.
            "down_w": _pack_conv_weight(nrm((cout, cin, 3, 3))).astype(jnp.bfloat16),
        })
        cur = nxt
    return params


if __name__ == "__main__":
    key = jax.random.PRNGKey(0)
    kx, kp = jax.random.split(key)

    # opt.semantic_nc=4, opt.ngf=8, n_2xdown=2; input is NCHW like PyTorch.
    N, C_in, H, W = 2, 4, 16, 16
    ngf, n_2xdown = 8, 2

    x_nchw = jax.random.normal(kx, (N, C_in, H, W), jnp.float32)
    params = init_params(kp, C_in, ngf, n_2xdown)

    out_nchw = lip_encoder_forward(x_nchw, params, n_2xdown)
    jax.block_until_ready(out_nchw)

    assert out_nchw.shape == (N, ngf * 4, H // 4, W // 4), out_nchw.shape
    assert bool(jnp.all(jnp.isfinite(out_nchw)))
    print("KERNEL_OK")
</pallas_src>

<mosaic_0001>
module attributes {stable_mosaic.version = 11 : i64} {
  func.func @kernel(%arg0: i32, %arg1: memref<1x4x256xf32, #tpu.memory_space<vmem>>, %arg2: memref<2x256xf32, #tpu.memory_space<vmem>>, %arg3: memref<2x64xf32, #tpu.memory_space<vmem>>, %arg4: memref<2x16xf32, #tpu.memory_space<vmem>>, %arg5: memref<8x36xbf16, #tpu.memory_space<vmem>>, %arg6: memref<8x72xbf16, #tpu.memory_space<vmem>>, %arg7: memref<8x1xf32, #tpu.memory_space<vmem>>, %arg8: memref<8x1xf32, #tpu.memory_space<vmem>>, %arg9: memref<256x64xf32, #tpu.memory_space<vmem>>, %arg10: memref<16x72xbf16, #tpu.memory_space<vmem>>, %arg11: memref<16x144xbf16, #tpu.memory_space<vmem>>, %arg12: memref<16x1xf32, #tpu.memory_space<vmem>>, %arg13: memref<16x1xf32, #tpu.memory_space<vmem>>, %arg14: memref<64x16xf32, #tpu.memory_space<vmem>>, %arg15: memref<32x144xbf16, #tpu.memory_space<vmem>>, %arg16: memref<1x32x16xf32, #tpu.memory_space<vmem>>, %arg17: memref<36x256xf32, #tpu.memory_space<vmem>>, %arg18: memref<72x256xf32, #tpu.memory_space<vmem>>, %arg19: memref<72x64xf32, #tpu.memory_space<vmem>>, %arg20: memref<144x64xf32, #tpu.memory_space<vmem>>, %arg21: memref<144x16xf32, #tpu.memory_space<vmem>>) attributes {dimension_semantics = [#tpu.dimension_semantics<parallel>], iteration_bounds = array<i64: 2>, scalar_prefetch = 0 : i64, scratch_operands = 5 : i64, tpu.core_type = #tpu.core_type<tc>, window_params = [{transform_indices = @transform_0, window_bounds = array<i64: 1, 4, 256>}, {pipeline_mode = #tpu.pipeline_mode<synchronous>, transform_indices = @transform_1, window_bounds = array<i64: 2, 256>}, {pipeline_mode = #tpu.pipeline_mode<synchronous>, transform_indices = @transform_2, window_bounds = array<i64: 2, 64>}, {pipeline_mode = #tpu.pipeline_mode<synchronous>, transform_indices = @transform_3, window_bounds = array<i64: 2, 16>}, {pipeline_mode = #tpu.pipeline_mode<synchronous>, transform_indices = @transform_4, window_bounds = array<i64: 8, 36>}, {pipeline_mode = #tpu.pipeline_mode<synchronous>, transform_indices = @transform_5, window_bounds = array<i64: 8, 72>}, {pipeline_mode = #tpu.pipeline_mode<synchronous>, transform_indices = @transform_6, window_bounds = array<i64: 8, 1>}, {pipeline_mode = #tpu.pipeline_mode<synchronous>, transform_indices = @transform_7, window_bounds = array<i64: 8, 1>}, {pipeline_mode = #tpu.pipeline_mode<synchronous>, transform_indices = @transform_8, window_bounds = array<i64: 256, 64>}, {pipeline_mode = #tpu.pipeline_mode<synchronous>, transform_indices = @transform_9, window_bounds = array<i64: 16, 72>}, {pipeline_mode = #tpu.pipeline_mode<synchronous>, transform_indices = @transform_10, window_bounds = array<i64: 16, 144>}, {pipeline_mode = #tpu.pipeline_mode<synchronous>, transform_indices = @transform_11, window_bounds = array<i64: 16, 1>}, {pipeline_mode = #tpu.pipeline_mode<synchronous>, transform_indices = @transform_12, window_bounds = array<i64: 16, 1>}, {pipeline_mode = #tpu.pipeline_mode<synchronous>, transform_indices = @transform_13, window_bounds = array<i64: 64, 16>}, {pipeline_mode = #tpu.pipeline_mode<synchronous>, transform_indices = @transform_14, window_bounds = array<i64: 32, 144>}, {transform_indices = @transform_15, window_bounds = array<i64: 1, 32, 16>}]} {
    %c0 = arith.constant 0 : index
    %c0_0 = arith.constant 0 : index
    %0 = vector.load %arg2[%c0, %c0_0] : memref<2x256xf32, #tpu.memory_space<vmem>>, vector<2x256xf32>
    %c0_1 = arith.constant 0 : index
    %c0_2 = arith.constant 0 : index
    %1 = vector.load %arg3[%c0_1, %c0_2] : memref<2x64xf32, #tpu.memory_space<vmem>>, vector<2x64xf32>
    %c0_3 = arith.constant 0 : index
    %c0_4 = arith.constant 0 : index
    %2 = vector.load %arg4[%c0_3, %c0_4] : memref<2x16xf32, #tpu.memory_space<vmem>>, vector<2x16xf32>
    %c0_5 = arith.constant 0 : index
    %c0_6 = arith.constant 0 : index
    %3 = vector.load %arg5[%c0_5, %c0_6] : memref<8x36xbf16, #tpu.memory_space<vmem>>, vector<8x36xbf16>
    %c0_7 = arith.constant 0 : index
    %c0_8 = arith.constant 0 : index
    %c0_9 = arith.constant 0 : index
    %4 = vector.load %arg1[%c0_7, %c0_8, %c0_9] : memref<1x4x256xf32, #tpu.memory_space<vmem>>, vector<1x4x256xf32>
    %5 = vector.shape_cast %4 : vector<1x4x256xf32> to vector<4x256xf32>
    %6 = vector.extract_strided_slice %0 {offsets = [0, 0], sizes = [1, 256], strides = [1, 1]} : vector<2x256xf32> to vector<1x256xf32>
    %7 = vector.extract_strided_slice %0 {offsets = [1, 0], sizes = [1, 256], strides = [1, 1]} : vector<2x256xf32> to vector<1x256xf32>
    %cst = arith.constant 0.000000e+00 : f32
    %8 = vector.broadcast %cst : f32 to vector<36x256xf32>
    %c0_10 = arith.constant 0 : index
    %c0_11 = arith.constant 0 : index
    %9 = vector.load %arg17[%c0_10, %c0_11] : memref<36x256xf32, #tpu.memory_space<vmem>>, vector<36x256xf32>
    tpu.vector_store %arg17[%c0_10, %c0_11], %8 {strides = array<i32>} : memref<36x256xf32, #tpu.memory_space<vmem>>, vector<36x256xf32>,
    %10 = vector.extract_strided_slice %5 {offsets = [0, 0], sizes = [4, 239], strides = [1, 1]} : vector<4x256xf32> to vector<4x239xf32>
    %11 = vector.extract_strided_slice %6 {offsets = [0, 17], sizes = [1, 239], strides = [1, 1]} : vector<1x256xf32> to vector<1x239xf32>
    %12 = vector.broadcast %11 : vector<1x239xf32> to vector<4x239xf32>
    %13 = arith.mulf %10, %12 : vector<4x239xf32>
    %c0_12 = arith.constant 0 : index
    %c17 = arith.constant 17 : index
    %14 = vector.load %arg17[%c0_12, %c17] : memref<36x256xf32, #tpu.memory_space<vmem>>, vector<4x239xf32>
    tpu.vector_store %arg17[%c0_12, %c17], %13 {strides = array<i32>} : memref<36x256xf32, #tpu.memory_space<vmem>>, vector<4x239xf32>,
    %15 = vector.extract_strided_slice %5 {offsets = [0, 0], sizes = [4, 240], strides = [1, 1]} : vector<4x256xf32> to vector<4x240xf32>
    %c4 = arith.constant 4 : index
    %c16 = arith.constant 16 : index
    %16 = vector.load %arg17[%c4, %c16] : memref<36x256xf32, #tpu.memory_space<vmem>>, vector<4x240xf32>
    tpu.vector_store %arg17[%c4, %c16], %15 {strides = array<i32>} : memref<36x256xf32, #tpu.memory_space<vmem>>, vector<4x240xf32>,
    %17 = vector.extract_strided_slice %5 {offsets = [0, 0], sizes = [4, 241], strides = [1, 1]} : vector<4x256xf32> to vector<4x241xf32>
    %18 = vector.extract_strided_slice %7 {offsets = [0, 15], sizes = [1, 241], strides = [1, 1]} : vector<1x256xf32> to vector<1x241xf32>
    %19 = vector.broadcast %18 : vector<1x241xf32> to vector<4x241xf32>
    %20 = arith.mulf %17, %19 : vector<4x241xf32>
    %c8 = arith.constant 8 : index
    %c15 = arith.constant 15 : index
    %21 = vector.load %arg17[%c8, %c15] : memref<36x256xf32, #tpu.memory_space<vmem>>, vector<4x241xf32>
    tpu.vector_store %arg17[%c8, %c15], %20 {strides = array<i32>} : memref<36x256xf32, #tpu.memory_space<vmem>>, vector<4x241xf32>,
    %22 = vector.extract_strided_slice %5 {offsets = [0, 0], sizes = [4, 255], strides = [1, 1]} : vector<4x256xf32> to vector<4x255xf32>
    %23 = vector.extract_strided_slice %6 {offsets = [0, 1], sizes = [1, 255], strides = [1, 1]} : vector<1x256xf32> to vector<1x255xf32>
    %24 = vector.broadcast %23 : vector<1x255xf32> to vector<4x255xf32>
    %25 = arith.mulf %22, %24 : vector<4x255xf32>
    %c12 = arith.constant 12 : index
    %c1 = arith.constant 1 : index
    %26 = vector.load %arg17[%c12, %c1] : memref<36x256xf32, #tpu.memory_space<vmem>>, vector<4x255xf32>
    tpu.vector_store %arg17[%c12, %c1], %25 {strides = array<i32>} : memref<36x256xf32, #tpu.memory_space<vmem>>, vector<4x255xf32>,
    %c16_13 = arith.constant 16 : index
    %c0_14 = arith.constant 0 : index
    %27 = vector.load %arg17[%c16_13, %c0_14] : memref<36x256xf32, #tpu.memory_space<vmem>>, vector<4x256xf32>
    tpu.vector_store %arg17[%c16_13, %c0_14], %5 {strides = array<i32>} : memref<36x256xf32, #tpu.memory_space<vmem>>, vector<4x256xf32>,
    %28 = vector.extract_strided_slice %5 {offsets = [0, 1], sizes = [4, 255], strides = [1, 1]} : vector<4x256xf32> to vector<4x255xf32>
    %29 = vector.extract_strided_slice %7 {offsets = [0, 0], sizes = [1, 255], strides = [1, 1]} : vector<1x256xf32> to vector<1x255xf32>
    %30 = vector.broadcast %29 : vector<1x255xf32> to vector<4x255xf32>
    %31 = arith.mulf %28, %30 : vector<4x255xf32>
    %c20 = arith.constant 20 : index
    %c0_15 = arith.constant 0 : index
    %32 = vector.load %arg17[%c20, %c0_15] : memref<36x256xf32, #tpu.memory_space<vmem>>, vector<4x255xf32>
    tpu.vector_store %arg17[%c20, %c0_15], %31 {strides = array<i32>} : memref<36x256xf32, #tpu.memory_space<vmem>>, vector<4x255xf32>,
    %33 = vector.extract_strided_slice %5 {offsets = [0, 15], sizes = [4, 241], strides = [1, 1]} : vector<4x256xf32> to vector<4x241xf32>
    %34 = vector.extract_strided_slice %6 {offsets = [0, 0], sizes = [1, 241], strides = [1, 1]} : vector<1x256xf32> to vector<1x241xf32>
    %35 = vector.broadcast %34 : vector<1x241xf32> to vector<4x241xf32>
    %36 = arith.mulf %33, %35 : vector<4x241xf32>
    %c24 = arith.constant 24 : index
    %c0_16 = arith.constant 0 : index
    %37 = vector.load %arg17[%c24, %c0_16] : memref<36x256xf32, #tpu.memory_space<vmem>>, vector<4x241xf32>
    tpu.vector_store %arg17[%c24, %c0_16], %36 {strides = array<i32>} : memref<36x256xf32, #tpu.memory_space<vmem>>, vector<4x241xf32>,
    %38 = vector.extract_strided_slice %5 {offsets = [0, 16], sizes = [4, 240], strides = [1, 1]} : vector<4x256xf32> to vector<4x240xf32>
    %c28 = arith.constant 28 : index
    %c0_17 = arith.constant 0 : index
    %39 = vector.load %arg17[%c28, %c0_17] : memref<36x256xf32, #tpu.memory_space<vmem>>, vector<4x240xf32>
    tpu.vector_store %arg17[%c28, %c0_17], %38 {strides = array<i32>} : memref<36x256xf32, #tpu.memory_space<vmem>>, vector<4x240xf32>,
    %40 = vector.extract_strided_slice %5 {offsets = [0, 17], sizes = [4, 239], strides = [1, 1]} : vector<4x256xf32> to vector<4x239xf32>
    %41 = vector.extract_strided_slice %7 {offsets = [0, 0], sizes = [1, 239], strides = [1, 1]} : vector<1x256xf32> to vector<1x239xf32>
    %42 = vector.broadcast %41 : vector<1x239xf32> to vector<4x239xf32>
    %43 = arith.mulf %40, %42 : vector<4x239xf32>
    %c32 = arith.constant 32 : index
    %c0_18 = arith.constant 0 : index
    %44 = vector.load %arg17[%c32, %c0_18] : memref<36x256xf32, #tpu.memory_space<vmem>>, vector<4x239xf32>
    tpu.vector_store %arg17[%c32, %c0_18], %43 {strides = array<i32>} : memref<36x256xf32, #tpu.memory_space<vmem>>, vector<4x239xf32>,
    %c0_19 = arith.constant 0 : index
    %c0_20 = arith.constant 0 : index
    %45 = vector.load %arg17[%c0_19, %c0_20] : memref<36x256xf32, #tpu.memory_space<vmem>>, vector<36x256xf32>
    %46 = arith.truncf %45 : vector<36x256xf32> to vector<36x256xbf16>
    %cst_21 = arith.constant dense<0.000000e+00> : vector<8x256xf32>
    %47 = tpu.matmul %3, %46, %cst_21 {dimension_numbers = #tpu.dot_dimension_numbers<[1], [0], [0], [1], [0, 0, 1, 1], [], []>} : vector<8x36xbf16>, vector<36x256xbf16>, vector<8x256xf32> -> vector<8x256xf32>
    %cst_22 = arith.constant dense<0.000000e+00> : vector<8xf32>
    %48 = vector.multi_reduction <add>, %47, %cst_22 [1] : vector<8x256xf32> to vector<8xf32>
    %49 = vector.shape_cast %48 : vector<8xf32> to vector<8x1xf32>
    %cst_23 = arith.constant 3.906250e-03 : f32
    %50 = vector.broadcast %cst_23 : f32 to vector<8x1xf32>
    %51 = arith.mulf %49, %50 : vector<8x1xf32>
    %52 = arith.mulf %47, %47 : vector<8x256xf32>
    %cst_24 = arith.constant dense<0.000000e+00> : vector<8xf32>
    %53 = vector.multi_reduction <add>, %52, %cst_24 [1] : vector<8x256xf32> to vector<8xf32>
    %54 = vector.shape_cast %53 : vector<8xf32> to vector<8x1xf32>
    %cst_25 = arith.constant 3.906250e-03 : f32
    %55 = vector.broadcast %cst_25 : f32 to vector<8x1xf32>
    %56 = arith.mulf %54, %55 : vector<8x1xf32>
    %57 = arith.mulf %51, %51 : vector<8x1xf32>
    %58 = arith.subf %56, %57 : vector<8x1xf32>
    %cst_26 = arith.constant 0.000000e+00 : f32
    %59 = vector.broadcast %cst_26 : f32 to vector<8x1xf32>
    %60 = arith.maximumf %58, %59 : vector<8x1xf32>
    %61 = vector.broadcast %51 : vector<8x1xf32> to vector<8x256xf32>
    %62 = arith.subf %47, %61 : vector<8x256xf32>
    %cst_27 = arith.constant 9.99999974E-6 : f32
    %63 = vector.broadcast %cst_27 : f32 to vector<8x1xf32>
    %64 = arith.addf %60, %63 : vector<8x1xf32>
    %65 = math.rsqrt %64 : vector<8x1xf32>
    %66 = vector.broadcast %65 : vector<8x1xf32> to vector<8x256xf32>
    %67 = arith.mulf %62, %66 : vector<8x256xf32>
    %cst_28 = arith.constant 0.000000e+00 : f32
    %68 = vector.broadcast %cst_28 : f32 to vector<8x256xf32>
    %69 = arith.maximumf %67, %68 : vector<8x256xf32>
    %c0_29 = arith.constant 0 : index
    %c0_30 = arith.constant 0 : index
    %70 = vector.load %arg6[%c0_29, %c0_30] : memref<8x72xbf16, #tpu.memory_space<vmem>>, vector<8x72xbf16>
    %c0_31 = arith.constant 0 : index
    %c0_32 = arith.constant 0 : index
    %71 = vector.load %arg7[%c0_31, %c0_32] : memref<8x1xf32, #tpu.memory_space<vmem>>, vector<8x1xf32>
    %c0_33 = arith.constant 0 : index
    %c0_34 = arith.constant 0 : index
    %72 = vector.load %arg8[%c0_33, %c0_34] : memref<8x1xf32, #tpu.memory_space<vmem>>, vector<8x1xf32>
    %c0_35 = arith.constant 0 : index
    %c0_36 = arith.constant 0 : index
    %73 = vector.load %arg9[%c0_35, %c0_36] : memref<256x64xf32, #tpu.memory_space<vmem>>, vector<256x64xf32>
    %c0_37 = arith.constant 0 : index
    %c0_38 = arith.constant 0 : index
    %74 = vector.load %arg10[%c0_37, %c0_38] : memref<16x72xbf16, #tpu.memory_space<vmem>>, vector<16x72xbf16>
    %75 = vector.extract_strided_slice %0 {offsets = [0, 0], sizes = [1, 256], strides = [1, 1]} : vector<2x256xf32> to vector<1x256xf32>
    %76 = vector.extract_strided_slice %0 {offsets = [1, 0], sizes = [1, 256], strides = [1, 1]} : vector<2x256xf32> to vector<1x256xf32>
    %cst_39 = arith.constant 0.000000e+00 : f32
    %77 = vector.broadcast %cst_39 : f32 to vector<72x256xf32>
    %c0_40 = arith.constant 0 : index
    %c0_41 = arith.constant 0 : index
    %78 = vector.load %arg18[%c0_40, %c0_41] : memref<72x256xf32, #tpu.memory_space<vmem>>, vector<72x256xf32>
    tpu.vector_store %arg18[%c0_40, %c0_41], %77 {strides = array<i32>} : memref<72x256xf32, #tpu.memory_space<vmem>>, vector<72x256xf32>,
    %79 = vector.extract_strided_slice %69 {offsets = [0, 0], sizes = [8, 239], strides = [1, 1]} : vector<8x256xf32> to vector<8x239xf32>
    %80 = vector.extract_strided_slice %75 {offsets = [0, 17], sizes = [1, 239], strides = [1, 1]} : vector<1x256xf32> to vector<1x239xf32>
    %81 = vector.broadcast %80 : vector<1x239xf32> to vector<8x239xf32>
    %82 = arith.mulf %79, %81 : vector<8x239xf32>
    %c0_42 = arith.constant 0 : index
    %c17_43 = arith.constant 17 : index
    %83 = vector.load %arg18[%c0_42, %c17_43] : memref<72x256xf32, #tpu.memory_space<vmem>>, vector<8x239xf32>
    tpu.vector_store %arg18[%c0_42, %c17_43], %82 {strides = array<i32>} : memref<72x256xf32, #tpu.memory_space<vmem>>, vector<8x239xf32>,
    %84 = vector.extract_strided_slice %69 {offsets = [0, 0], sizes = [8, 240], strides = [1, 1]} : vector<8x256xf32> to vector<8x240xf32>
    %c8_44 = arith.constant 8 : index
    %c16_45 = arith.constant 16 : index
    %85 = vector.load %arg18[%c8_44, %c16_45] : memref<72x256xf32, #tpu.memory_space<vmem>>, vector<8x240xf32>
    tpu.vector_store %arg18[%c8_44, %c16_45], %84 {strides = array<i32>} : memref<72x256xf32, #tpu.memory_space<vmem>>, vector<8x240xf32>,
    %86 = vector.extract_strided_slice %69 {offsets = [0, 0], sizes = [8, 241], strides = [1, 1]} : vector<8x256xf32> to vector<8x241xf32>
    %87 = vector.extract_strided_slice %76 {offsets = [0, 15], sizes = [1, 241], strides = [1, 1]} : vector<1x256xf32> to vector<1x241xf32>
    %88 = vector.broadcast %87 : vector<1x241xf32> to vector<8x241xf32>
    %89 = arith.mulf %86, %88 : vector<8x241xf32>
    %c16_46 = arith.constant 16 : index
    %c15_47 = arith.constant 15 : index
    %90 = vector.load %arg18[%c16_46, %c15_47] : memref<72x256xf32, #tpu.memory_space<vmem>>, vector<8x241xf32>
    tpu.vector_store %arg18[%c16_46, %c15_47], %89 {strides = array<i32>} : memref<72x256xf32, #tpu.memory_space<vmem>>, vector<8x241xf32>,
    %91 = vector.extract_strided_slice %69 {offsets = [0, 0], sizes = [8, 255], strides = [1, 1]} : vector<8x256xf32> to vector<8x255xf32>
    %92 = vector.extract_strided_slice %75 {offsets = [0, 1], sizes = [1, 255], strides = [1, 1]} : vector<1x256xf32> to vector<1x255xf32>
    %93 = vector.broadcast %92 : vector<1x255xf32> to vector<8x255xf32>
    %94 = arith.mulf %91, %93 : vector<8x255xf32>
    %c24_48 = arith.constant 24 : index
    %c1_49 = arith.constant 1 : index
    %95 = vector.load %arg18[%c24_48, %c1_49] : memref<72x256xf32, #tpu.memory_space<vmem>>, vector<8x255xf32>
    tpu.vector_store %arg18[%c24_48, %c1_49], %94 {strides = array<i32>} : memref<72x256xf32, #tpu.memory_space<vmem>>, vector<8x255xf32>,
    %c32_50 = arith.constant 32 : index
    %c0_51 = arith.constant 0 : index
    %96 = vector.load %arg18[%c32_50, %c0_51] : memref<72x256xf32, #tpu.memory_space<vmem>>, vector<8x256xf32>
    tpu.vector_store %arg18[%c32_50, %c0_51], %69 {strides = array<i32>} : memref<72x256xf32, #tpu.memory_space<vmem>>, vector<8x256xf32>,
    %97 = vector.extract_strided_slice %69 {offsets = [0, 1], sizes = [8, 255], strides = [1, 1]} : vector<8x256xf32> to vector<8x255xf32>
    %98 = vector.extract_strided_slice %76 {offsets = [0, 0], sizes = [1, 255], strides = [1, 1]} : vector<1x256xf32> to vector<1x255xf32>
    %99 = vector.broadcast %98 : vector<1x255xf32> to vector<8x255xf32>
    %100 = arith.mulf %97, %99 : vector<8x255xf32>
    %c40 = arith.constant 40 : index
    %c0_52 = arith.constant 0 : index
    %101 = vector.load %arg18[%c40, %c0_52] : memref<72x256xf32, #tpu.memory_space<vmem>>, vector<8x255xf32>
    tpu.vector_store %arg18[%c40, %c0_52], %100 {strides = array<i32>} : memref<72x256xf32, #tpu.memory_space<vmem>>, vector<8x255xf32>,
    %102 = vector.extract_strided_slice %69 {offsets = [0, 15], sizes = [8, 241], strides = [1, 1]} : vector<8x256xf32> to vector<8x241xf32>
    %103 = vector.extract_strided_slice %75 {offsets = [0, 0], sizes = [1, 241], strides = [1, 1]} : vector<1x256xf32> to vector<1x241xf32>
    %104 = vector.broadcast %103 : vector<1x241xf32> to vector<8x241xf32>
    %105 = arith.mulf %102, %104 : vector<8x241xf32>
    %c48 = arith.constant 48 : index
    %c0_53 = arith.constant 0 : index
    %106 = vector.load %arg18[%c48, %c0_53] : memref<72x256xf32, #tpu.memory_space<vmem>>, vector<8x241xf32>
    tpu.vector_store %arg18[%c48, %c0_53], %105 {strides = array<i32>} : memref<72x256xf32, #tpu.memory_space<vmem>>, vector<8x241xf32>,
    %107 = vector.extract_strided_slice %69 {offsets = [0, 16], sizes = [8, 240], strides = [1, 1]} : vector<8x256xf32> to vector<8x240xf32>
    %c56 = arith.constant 56 : index
    %c0_54 = arith.constant 0 : index
    %108 = vector.load %arg18[%c56, %c0_54] : memref<72x256xf32, #tpu.memory_space<vmem>>, vector<8x240xf32>
    tpu.vector_store %arg18[%c56, %c0_54], %107 {strides = array<i32>} : memref<72x256xf32, #tpu.memory_space<vmem>>, vector<8x240xf32>,
    %109 = vector.extract_strided_slice %69 {offsets = [0, 17], sizes = [8, 239], strides = [1, 1]} : vector<8x256xf32> to vector<8x239xf32>
    %110 = vector.extract_strided_slice %76 {offsets = [0, 0], sizes = [1, 239], strides = [1, 1]} : vector<1x256xf32> to vector<1x239xf32>
    %111 = vector.broadcast %110 : vector<1x239xf32> to vector<8x239xf32>
    %112 = arith.mulf %109, %111 : vector<8x239xf32>
    %c64 = arith.constant 64 : index
    %c0_55 = arith.constant 0 : index
    %113 = vector.load %arg18[%c64, %c0_55] : memref<72x256xf32, #tpu.memory_space<vmem>>, vector<8x239xf32>
    tpu.vector_store %arg18[%c64, %c0_55], %112 {strides = array<i32>} : memref<72x256xf32, #tpu.memory_space<vmem>>, vector<8x239xf32>,
    %c0_56 = arith.constant 0 : index
    %c0_57 = arith.constant 0 : index
    %114 = vector.load %arg18[%c0_56, %c0_57] : memref<72x256xf32, #tpu.memory_space<vmem>>, vector<72x256xf32>
    %115 = arith.truncf %114 : vector<72x256xf32> to vector<72x256xbf16>
    %cst_58 = arith.constant dense<0.000000e+00> : vector<8x256xf32>
    %116 = tpu.matmul %70, %115, %cst_58 {dimension_numbers = #tpu.dot_dimension_numbers<[1], [0], [0], [1], [0, 0, 1, 1], [], []>} : vector<8x72xbf16>, vector<72x256xbf16>, vector<8x256xf32> -> vector<8x256xf32>
    %cst_59 = arith.constant dense<0.000000e+00> : vector<8xf32>
    %117 = vector.multi_reduction <add>, %116, %cst_59 [1] : vector<8x256xf32> to vector<8xf32>
    %118 = vector.shape_cast %117 : vector<8xf32> to vector<8x1xf32>
    %cst_60 = arith.constant 3.906250e-03 : f32
    %119 = vector.broadcast %cst_60 : f32 to vector<8x1xf32>
    %120 = arith.mulf %118, %119 : vector<8x1xf32>
    %121 = arith.mulf %116, %116 : vector<8x256xf32>
    %cst_61 = arith.constant dense<0.000000e+00> : vector<8xf32>
    %122 = vector.multi_reduction <add>, %121, %cst_61 [1] : vector<8x256xf32> to vector<8xf32>
    %123 = vector.shape_cast %122 : vector<8xf32> to vector<8x1xf32>
    %cst_62 = arith.constant 3.906250e-03 : f32
    %124 = vector.broadcast %cst_62 : f32 to vector<8x1xf32>
    %125 = arith.mulf %123, %124 : vector<8x1xf32>
    %126 = arith.mulf %120, %120 : vector<8x1xf32>
    %127 = arith.subf %125, %126 : vector<8x1xf32>
    %cst_63 = arith.constant 0.000000e+00 : f32
    %128 = vector.broadcast %cst_63 : f32 to vector<8x1xf32>
    %129 = arith.maximumf %127, %128 : vector<8x1xf32>
    %130 = vector.broadcast %120 : vector<8x1xf32> to vector<8x256xf32>
    %131 = arith.subf %116, %130 : vector<8x256xf32>
    %cst_64 = arith.constant 9.99999974E-6 : f32
    %132 = vector.broadcast %cst_64 : f32 to vector<8x1xf32>
    %133 = arith.addf %129, %132 : vector<8x1xf32>
    %134 = math.rsqrt %133 : vector<8x1xf32>
    %135 = vector.broadcast %134 : vector<8x1xf32> to vector<8x256xf32>
    %136 = arith.mulf %131, %135 : vector<8x256xf32>
    %137 = vector.broadcast %71 : vector<8x1xf32> to vector<8x256xf32>
    %138 = arith.mulf %136, %137 : vector<8x256xf32>
    %139 = vector.broadcast %72 : vector<8x1xf32> to vector<8x256xf32>
    %140 = arith.addf %138, %139 : vector<8x256xf32>
    %cst_65 = arith.constant 0.000000e+00 : f32
    %141 = vector.broadcast %cst_65 : f32 to vector<8x256xf32>
    %142 = arith.subf %141, %140 : vector<8x256xf32>
    %143 = math.exp %142 : vector<8x256xf32>
    %cst_66 = arith.constant 1.000000e+00 : f32
    %144 = vector.broadcast %cst_66 : f32 to vector<8x256xf32>
    %145 = arith.addf %144, %143 : vector<8x256xf32>
    %cst_67 = arith.constant 1.000000e+00 : f32
    %146 = vector.broadcast %cst_67 : f32 to vector<8x256xf32>
    %147 = arith.divf %146, %145 : vector<8x256xf32>
    %cst_68 = arith.constant 1.200000e+01 : f32
    %148 = vector.broadcast %cst_68 : f32 to vector<8x256xf32>
    %149 = arith.mulf %148, %147 : vector<8x256xf32>
    %150 = math.exp %149 : vector<8x256xf32>
    %151 = arith.mulf %69, %150 : vector<8x256xf32>
    %cst_69 = arith.constant dense<0.000000e+00> : vector<8x64xf32>
    %152 = tpu.matmul %151, %73, %cst_69 {dimension_numbers = #tpu.dot_dimension_numbers<[1], [0], [0], [1], [0, 0, 1, 1], [], []>} : vector<8x256xf32>, vector<256x64xf32>, vector<8x64xf32> -> vector<8x64xf32>
    %cst_70 = arith.constant dense<0.000000e+00> : vector<8x64xf32>
    %153 = tpu.matmul %150, %73, %cst_70 {dimension_numbers = #tpu.dot_dimension_numbers<[1], [0], [0], [1], [0, 0, 1, 1], [], []>} : vector<8x256xf32>, vector<256x64xf32>, vector<8x64xf32> -> vector<8x64xf32>
    %154 = tpu.reciprocal %153 {approx = true} : vector<8x64xf32> -> vector<8x64xf32>
    %155 = arith.mulf %152, %154 : vector<8x64xf32>
    %156 = vector.extract_strided_slice %1 {offsets = [0, 0], sizes = [1, 64], strides = [1, 1]} : vector<2x64xf32> to vector<1x64xf32>
    %157 = vector.extract_strided_slice %1 {offsets = [1, 0], sizes = [1, 64], strides = [1, 1]} : vector<2x64xf32> to vector<1x64xf32>
    %cst_71 = arith.constant 0.000000e+00 : f32
    %158 = vector.broadcast %cst_71 : f32 to vector<72x64xf32>
    %c0_72 = arith.constant 0 : index
    %c0_73 = arith.constant 0 : index
    %159 = vector.load %arg19[%c0_72, %c0_73] : memref<72x64xf32, #tpu.memory_space<vmem>>, vector<72x64xf32>
    tpu.vector_store %arg19[%c0_72, %c0_73], %158 {strides = array<i32>} : memref<72x64xf32, #tpu.memory_space<vmem>>, vector<72x64xf32>,
    %160 = vector.extract_strided_slice %155 {offsets = [0, 0], sizes = [8, 55], strides = [1, 1]} : vector<8x64xf32> to vector<8x55xf32>
    %161 = vector.extract_strided_slice %156 {offsets = [0, 9], sizes = [1, 55], strides = [1, 1]} : vector<1x64xf32> to vector<1x55xf32>
    %162 = vector.broadcast %161 : vector<1x55xf32> to vector<8x55xf32>
    %163 = arith.mulf %160, %162 : vector<8x55xf32>
    %c0_74 = arith.constant 0 : index
    %c9 = arith.constant 9 : index
    %164 = vector.load %arg19[%c0_74, %c9] : memref<72x64xf32, #tpu.memory_space<vmem>>, vector<8x55xf32>
    tpu.vector_store %arg19[%c0_74, %c9], %163 {strides = array<i32>} : memref<72x64xf32, #tpu.memory_space<vmem>>, vector<8x55xf32>,
    %165 = vector.extract_strided_slice %155 {offsets = [0, 0], sizes = [8, 56], strides = [1, 1]} : vector<8x64xf32> to vector<8x56xf32>
    %c8_75 = arith.constant 8 : index
    %c8_76 = arith.constant 8 : index
    %166 = vector.load %arg19[%c8_75, %c8_76] : memref<72x64xf32, #tpu.memory_space<vmem>>, vector<8x56xf32>
    tpu.vector_store %arg19[%c8_75, %c8_76], %165 {strides = array<i32>} : memref<72x64xf32, #tpu.memory_space<vmem>>, vector<8x56xf32>,
    %167 = vector.extract_strided_slice %155 {offsets = [0, 0], sizes = [8, 57], strides = [1, 1]} : vector<8x64xf32> to vector<8x57xf32>
    %168 = vector.extract_strided_slice %157 {offsets = [0, 7], sizes = [1, 57], strides = [1, 1]} : vector<1x64xf32> to vector<1x57xf32>
    %169 = vector.broadcast %168 : vector<1x57xf32> to vector<8x57xf32>
    %170 = arith.mulf %167, %169 : vector<8x57xf32>
    %c16_77 = arith.constant 16 : index
    %c7 = arith.constant 7 : index
    %171 = vector.load %arg19[%c16_77, %c7] : memref<72x64xf32, #tpu.memory_space<vmem>>, vector<8x57xf32>
    tpu.vector_store %arg19[%c16_77, %c7], %170 {strides = array<i32>} : memref<72x64xf32, #tpu.memory_space<vmem>>, vector<8x57xf32>,
    %172 = vector.extract_strided_slice %155 {offsets = [0, 0], sizes = [8, 63], strides = [1, 1]} : vector<8x64xf32> to vector<8x63xf32>
    %173 = vector.extract_strided_slice %156 {offsets = [0, 1], sizes = [1, 63], strides = [1, 1]} : vector<1x64xf32> to vector<1x63xf32>
    %174 = vector.broadcast %173 : vector<1x63xf32> to vector<8x63xf32>
    %175 = arith.mulf %172, %174 : vector<8x63xf32>
    %c24_78 = arith.constant 24 : index
    %c1_79 = arith.constant 1 : index
    %176 = vector.load %arg19[%c24_78, %c1_79] : memref<72x64xf32, #tpu.memory_space<vmem>>, vector<8x63xf32>
    tpu.vector_store %arg19[%c24_78, %c1_79], %175 {strides = array<i32>} : memref<72x64xf32, #tpu.memory_space<vmem>>, vector<8x63xf32>,
    %c32_80 = arith.constant 32 : index
    %c0_81 = arith.constant 0 : index
    %177 = vector.load %arg19[%c32_80, %c0_81] : memref<72x64xf32, #tpu.memory_space<vmem>>, vector<8x64xf32>
    tpu.vector_store %arg19[%c32_80, %c0_81], %155 {strides = array<i32>} : memref<72x64xf32, #tpu.memory_space<vmem>>, vector<8x64xf32>,
    %178 = vector.extract_strided_slice %155 {offsets = [0, 1], sizes = [8, 63], strides = [1, 1]} : vector<8x64xf32> to vector<8x63xf32>
    %179 = vector.extract_strided_slice %157 {offsets = [0, 0], sizes = [1, 63], strides = [1, 1]} : vector<1x64xf32> to vector<1x63xf32>
    %180 = vector.broadcast %179 : vector<1x63xf32> to vector<8x63xf32>
    %181 = arith.mulf %178, %180 : vector<8x63xf32>
    %c40_82 = arith.constant 40 : index
    %c0_83 = arith.constant 0 : index
    %182 = vector.load %arg19[%c40_82, %c0_83] : memref<72x64xf32, #tpu.memory_space<vmem>>, vector<8x63xf32>
    tpu.vector_store %arg19[%c40_82, %c0_83], %181 {strides = array<i32>} : memref<72x64xf32, #tpu.memory_space<vmem>>, vector<8x63xf32>,
    %183 = vector.extract_strided_slice %155 {offsets = [0, 7], sizes = [8, 57], strides = [1, 1]} : vector<8x64xf32> to vector<8x57xf32>
    %184 = vector.extract_strided_slice %156 {offsets = [0, 0], sizes = [1, 57], strides = [1, 1]} : vector<1x64xf32> to vector<1x57xf32>
    %185 = vector.broadcast %184 : vector<1x57xf32> to vector<8x57xf32>
    %186 = arith.mulf %183, %185 : vector<8x57xf32>
    %c48_84 = arith.constant 48 : index
    %c0_85 = arith.constant 0 : index
    %187 = vector.load %arg19[%c48_84, %c0_85] : memref<72x64xf32, #tpu.memory_space<vmem>>, vector<8x57xf32>
    tpu.vector_store %arg19[%c48_84, %c0_85], %186 {strides = array<i32>} : memref<72x64xf32, #tpu.memory_space<vmem>>, vector<8x57xf32>,
    %188 = vector.extract_strided_slice %155 {offsets = [0, 8], sizes = [8, 56], strides = [1, 1]} : vector<8x64xf32> to vector<8x56xf32>
    %c56_86 = arith.constant 56 : index
    %c0_87 = arith.constant 0 : index
    %189 = vector.load %arg19[%c56_86, %c0_87] : memref<72x64xf32, #tpu.memory_space<vmem>>, vector<8x56xf32>
    tpu.vector_store %arg19[%c56_86, %c0_87], %188 {strides = array<i32>} : memref<72x64xf32, #tpu.memory_space<vmem>>, vector<8x56xf32>,
    %190 = vector.extract_strided_slice %155 {offsets = [0, 9], sizes = [8, 55], strides = [1, 1]} : vector<8x64xf32> to vector<8x55xf32>
    %191 = vector.extract_strided_slice %157 {offsets = [0, 0], sizes = [1, 55], strides = [1, 1]} : vector<1x64xf32> to vector<1x55xf32>
    %192 = vector.broadcast %191 : vector<1x55xf32> to vector<8x55xf32>
    %193 = arith.mulf %190, %192 : vector<8x55xf32>
    %c64_88 = arith.constant 64 : index
    %c0_89 = arith.constant 0 : index
    %194 = vector.load %arg19[%c64_88, %c0_89] : memref<72x64xf32, #tpu.memory_space<vmem>>, vector<8x55xf32>
    tpu.vector_store %arg19[%c64_88, %c0_89], %193 {strides = array<i32>} : memref<72x64xf32, #tpu.memory_space<vmem>>, vector<8x55xf32>,
    %c0_90 = arith.constant 0 : index
    %c0_91 = arith.constant 0 : index
    %195 = vector.load %arg19[%c0_90, %c0_91] : memref<72x64xf32, #tpu.memory_space<vmem>>, vector<72x64xf32>
    %196 = arith.truncf %195 : vector<72x64xf32> to vector<72x64xbf16>
    %cst_92 = arith.constant dense<0.000000e+00> : vector<16x64xf32>
    %197 = tpu.matmul %74, %196, %cst_92 {dimension_numbers = #tpu.dot_dimension_numbers<[1], [0], [0], [1], [0, 0, 1, 1], [], []>} : vector<16x72xbf16>, vector<72x64xbf16>, vector<16x64xf32> -> vector<16x64xf32>
    %cst_93 = arith.constant dense<0.000000e+00> : vector<16xf32>
    %198 = vector.multi_reduction <add>, %197, %cst_93 [1] : vector<16x64xf32> to vector<16xf32>
    %199 = vector.shape_cast %198 : vector<16xf32> to vector<16x1xf32>
    %cst_94 = arith.constant 1.562500e-02 : f32
    %200 = vector.broadcast %cst_94 : f32 to vector<16x1xf32>
    %201 = arith.mulf %199, %200 : vector<16x1xf32>
    %202 = arith.mulf %197, %197 : vector<16x64xf32>
    %cst_95 = arith.constant dense<0.000000e+00> : vector<16xf32>
    %203 = vector.multi_reduction <add>, %202, %cst_95 [1] : vector<16x64xf32> to vector<16xf32>
    %204 = vector.shape_cast %203 : vector<16xf32> to vector<16x1xf32>
    %cst_96 = arith.constant 1.562500e-02 : f32
    %205 = vector.broadcast %cst_96 : f32 to vector<16x1xf32>
    %206 = arith.mulf %204, %205 : vector<16x1xf32>
    %207 = arith.mulf %201, %201 : vector<16x1xf32>
    %208 = arith.subf %206, %207 : vector<16x1xf32>
    %cst_97 = arith.constant 0.000000e+00 : f32
    %209 = vector.broadcast %cst_97 : f32 to vector<16x1xf32>
    %210 = arith.maximumf %208, %209 : vector<16x1xf32>
    %211 = vector.broadcast %201 : vector<16x1xf32> to vector<16x64xf32>
    %212 = arith.subf %197, %211 : vector<16x64xf32>
    %cst_98 = arith.constant 9.99999974E-6 : f32
    %213 = vector.broadcast %cst_98 : f32 to vector<16x1xf32>
    %214 = arith.addf %210, %213 : vector<16x1xf32>
    %215 = math.rsqrt %214 : vector<16x1xf32>
    %216 = vector.broadcast %215 : vector<16x1xf32> to vector<16x64xf32>
    %217 = arith.mulf %212, %216 : vector<16x64xf32>
    %cst_99 = arith.constant 0.000000e+00 : f32
    %218 = vector.broadcast %cst_99 : f32 to vector<16x64xf32>
    %219 = arith.maximumf %217, %218 : vector<16x64xf32>
    %c0_100 = arith.constant 0 : index
    %c0_101 = arith.constant 0 : index
    %220 = vector.load %arg11[%c0_100, %c0_101] : memref<16x144xbf16, #tpu.memory_space<vmem>>, vector<16x144xbf16>
    %c0_102 = arith.constant 0 : index
    %c0_103 = arith.constant 0 : index
    %221 = vector.load %arg12[%c0_102, %c0_103] : memref<16x1xf32, #tpu.memory_space<vmem>>, vector<16x1xf32>
    %c0_104 = arith.constant 0 : index
    %c0_105 = arith.constant 0 : index
    %222 = vector.load %arg13[%c0_104, %c0_105] : memref<16x1xf32, #tpu.memory_space<vmem>>, vector<16x1xf32>
    %c0_106 = arith.constant 0 : index
    %c0_107 = arith.constant 0 : index
    %223 = vector.load %arg14[%c0_106, %c0_107] : memref<64x16xf32, #tpu.memory_space<vmem>>, vector<64x16xf32>
    %c0_108 = arith.constant 0 : index
    %c0_109 = arith.constant 0 : index
    %224 = vector.load %arg15[%c0_108, %c0_109] : memref<32x144xbf16, #tpu.memory_space<vmem>>, vector<32x144xbf16>
    %225 = vector.extract_strided_slice %1 {offsets = [0, 0], sizes = [1, 64], strides = [1, 1]} : vector<2x64xf32> to vector<1x64xf32>
    %226 = vector.extract_strided_slice %1 {offsets = [1, 0], sizes = [1, 64], strides = [1, 1]} : vector<2x64xf32> to vector<1x64xf32>
    %cst_110 = arith.constant 0.000000e+00 : f32
    %227 = vector.broadcast %cst_110 : f32 to vector<144x64xf32>
    %c0_111 = arith.constant 0 : index
    %c0_112 = arith.constant 0 : index
    %228 = vector.load %arg20[%c0_111, %c0_112] : memref<144x64xf32, #tpu.memory_space<vmem>>, vector<144x64xf32>
    tpu.vector_store %arg20[%c0_111, %c0_112], %227 {strides = array<i32>} : memref<144x64xf32, #tpu.memory_space<vmem>>, vector<144x64xf32>,
    %229 = vector.extract_strided_slice %219 {offsets = [0, 0], sizes = [16, 55], strides = [1, 1]} : vector<16x64xf32> to vector<16x55xf32>
    %230 = vector.extract_strided_slice %225 {offsets = [0, 9], sizes = [1, 55], strides = [1, 1]} : vector<1x64xf32> to vector<1x55xf32>
    %231 = vector.broadcast %230 : vector<1x55xf32> to vector<16x55xf32>
    %232 = arith.mulf %229, %231 : vector<16x55xf32>
    %c0_113 = arith.constant 0 : index
    %c9_114 = arith.constant 9 : index
    %233 = vector.load %arg20[%c0_113, %c9_114] : memref<144x64xf32, #tpu.memory_space<vmem>>, vector<16x55xf32>
    tpu.vector_store %arg20[%c0_113, %c9_114], %232 {strides = array<i32>} : memref<144x64xf32, #tpu.memory_space<vmem>>, vector<16x55xf32>,
    %234 = vector.extract_strided_slice %219 {offsets = [0, 0], sizes = [16, 56], strides = [1, 1]} : vector<16x64xf32> to vector<16x56xf32>
    %c16_115 = arith.constant 16 : index
    %c8_116 = arith.constant 8 : index
    %235 = vector.load %arg20[%c16_115, %c8_116] : memref<144x64xf32, #tpu.memory_space<vmem>>, vector<16x56xf32>
    tpu.vector_store %arg20[%c16_115, %c8_116], %234 {strides = array<i32>} : memref<144x64xf32, #tpu.memory_space<vmem>>, vector<16x56xf32>,
    %236 = vector.extract_strided_slice %219 {offsets = [0, 0], sizes = [16, 57], strides = [1, 1]} : vector<16x64xf32> to vector<16x57xf32>
    %237 = vector.extract_strided_slice %226 {offsets = [0, 7], sizes = [1, 57], strides = [1, 1]} : vector<1x64xf32> to vector<1x57xf32>
    %238 = vector.broadcast %237 : vector<1x57xf32> to vector<16x57xf32>
    %239 = arith.mulf %236, %238 : vector<16x57xf32>
    %c32_117 = arith.constant 32 : index
    %c7_118 = arith.constant 7 : index
    %240 = vector.load %arg20[%c32_117, %c7_118] : memref<144x64xf32, #tpu.memory_space<vmem>>, vector<16x57xf32>
    tpu.vector_store %arg20[%c32_117, %c7_118], %239 {strides = array<i32>} : memref<144x64xf32, #tpu.memory_space<vmem>>, vector<16x57xf32>,
    %241 = vector.extract_strided_slice %219 {offsets = [0, 0], sizes = [16, 63], strides = [1, 1]} : vector<16x64xf32> to vector<16x63xf32>
    %242 = vector.extract_strided_slice %225 {offsets = [0, 1], sizes = [1, 63], strides = [1, 1]} : vector<1x64xf32> to vector<1x63xf32>
    %243 = vector.broadcast %242 : vector<1x63xf32> to vector<16x63xf32>
    %244 = arith.mulf %241, %243 : vector<16x63xf32>
    %c48_119 = arith.constant 48 : index
    %c1_120 = arith.constant 1 : index
    %245 = vector.load %arg20[%c48_119, %c1_120] : memref<144x64xf32, #tpu.memory_space<vmem>>, vector<16x63xf32>
    tpu.vector_store %arg20[%c48_119, %c1_120], %244 {strides = array<i32>} : memref<144x64xf32, #tpu.memory_space<vmem>>, vector<16x63xf32>,
    %c64_121 = arith.constant 64 : index
    %c0_122 = arith.constant 0 : index
    %246 = vector.load %arg20[%c64_121, %c0_122] : memref<144x64xf32, #tpu.memory_space<vmem>>, vector<16x64xf32>
    tpu.vector_store %arg20[%c64_121, %c0_122], %219 {strides = array<i32>} : memref<144x64xf32, #tpu.memory_space<vmem>>, vector<16x64xf32>,
    %247 = vector.extract_strided_slice %219 {offsets = [0, 1], sizes = [16, 63], strides = [1, 1]} : vector<16x64xf32> to vector<16x63xf32>
    %248 = vector.extract_strided_slice %226 {offsets = [0, 0], sizes = [1, 63], strides = [1, 1]} : vector<1x64xf32> to vector<1x63xf32>
    %249 = vector.broadcast %248 : vector<1x63xf32> to vector<16x63xf32>
    %250 = arith.mulf %247, %249 : vector<16x63xf32>
    %c80 = arith.constant 80 : index
    %c0_123 = arith.constant 0 : index
    %251 = vector.load %arg20[%c80, %c0_123] : memref<144x64xf32, #tpu.memory_space<vmem>>, vector<16x63xf32>
    tpu.vector_store %arg20[%c80, %c0_123], %250 {strides = array<i32>} : memref<144x64xf32, #tpu.memory_space<vmem>>, vector<16x63xf32>,
    %252 = vector.extract_strided_slice %219 {offsets = [0, 7], sizes = [16, 57], strides = [1, 1]} : vector<16x64xf32> to vector<16x57xf32>
    %253 = vector.extract_strided_slice %225 {offsets = [0, 0], sizes = [1, 57], strides = [1, 1]} : vector<1x64xf32> to vector<1x57xf32>
    %254 = vector.broadcast %253 : vector<1x57xf32> to vector<16x57xf32>
    %255 = arith.mulf %252, %254 : vector<16x57xf32>
    %c96 = arith.constant 96 : index
    %c0_124 = arith.constant 0 : index
    %256 = vector.load %arg20[%c96, %c0_124] : memref<144x64xf32, #tpu.memory_space<vmem>>, vector<16x57xf32>
    tpu.vector_store %arg20[%c96, %c0_124], %255 {strides = array<i32>} : memref<144x64xf32, #tpu.memory_space<vmem>>, vector<16x57xf32>,
    %257 = vector.extract_strided_slice %219 {offsets = [0, 8], sizes = [16, 56], strides = [1, 1]} : vector<16x64xf32> to vector<16x56xf32>
    %c112 = arith.constant 112 : index
    %c0_125 = arith.constant 0 : index
    %258 = vector.load %arg20[%c112, %c0_125] : memref<144x64xf32, #tpu.memory_space<vmem>>, vector<16x56xf32>
    tpu.vector_store %arg20[%c112, %c0_125], %257 {strides = array<i32>} : memref<144x64xf32, #tpu.memory_space<vmem>>, vector<16x56xf32>,
    %259 = vector.extract_strided_slice %219 {offsets = [0, 9], sizes = [16, 55], strides = [1, 1]} : vector<16x64xf32> to vector<16x55xf32>
    %260 = vector.extract_strided_slice %226 {offsets = [0, 0], sizes = [1, 55], strides = [1, 1]} : vector<1x64xf32> to vector<1x55xf32>
    %261 = vector.broadcast %260 : vector<1x55xf32> to vector<16x55xf32>
    %262 = arith.mulf %259, %261 : vector<16x55xf32>
    %c128 = arith.constant 128 : index
    %c0_126 = arith.constant 0 : index
    %263 = vector.load %arg20[%c128, %c0_126] : memref<144x64xf32, #tpu.memory_space<vmem>>, vector<16x55xf32>
    tpu.vector_store %arg20[%c128, %c0_126], %262 {strides = array<i32>} : memref<144x64xf32, #tpu.memory_space<vmem>>, vector<16x55xf32>,
    %c0_127 = arith.constant 0 : index
    %c0_128 = arith.constant 0 : index
    %264 = vector.load %arg20[%c0_127, %c0_128] : memref<144x64xf32, #tpu.memory_space<vmem>>, vector<144x64xf32>
    %265 = arith.truncf %264 : vector<144x64xf32> to vector<144x64xbf16>
    %cst_129 = arith.constant dense<0.000000e+00> : vector<16x64xf32>
    %266 = tpu.matmul %220, %265, %cst_129 {dimension_numbers = #tpu.dot_dimension_numbers<[1], [0], [0], [1], [0, 0, 1, 1], [], []>} : vector<16x144xbf16>, vector<144x64xbf16>, vector<16x64xf32> -> vector<16x64xf32>
    %cst_130 = arith.constant dense<0.000000e+00> : vector<16xf32>
    %267 = vector.multi_reduction <add>, %266, %cst_130 [1] : vector<16x64xf32> to vector<16xf32>
    %268 = vector.shape_cast %267 : vector<16xf32> to vector<16x1xf32>
    %cst_131 = arith.constant 1.562500e-02 : f32
    %269 = vector.broadcast %cst_131 : f32 to vector<16x1xf32>
    %270 = arith.mulf %268, %269 : vector<16x1xf32>
    %271 = arith.mulf %266, %266 : vector<16x64xf32>
    %cst_132 = arith.constant dense<0.000000e+00> : vector<16xf32>
    %272 = vector.multi_reduction <add>, %271, %cst_132 [1] : vector<16x64xf32> to vector<16xf32>
    %273 = vector.shape_cast %272 : vector<16xf32> to vector<16x1xf32>
    %cst_133 = arith.constant 1.562500e-02 : f32
    %274 = vector.broadcast %cst_133 : f32 to vector<16x1xf32>
    %275 = arith.mulf %273, %274 : vector<16x1xf32>
    %276 = arith.mulf %270, %270 : vector<16x1xf32>
    %277 = arith.subf %275, %276 : vector<16x1xf32>
    %cst_134 = arith.constant 0.000000e+00 : f32
    %278 = vector.broadcast %cst_134 : f32 to vector<16x1xf32>
    %279 = arith.maximumf %277, %278 : vector<16x1xf32>
    %280 = vector.broadcast %270 : vector<16x1xf32> to vector<16x64xf32>
    %281 = arith.subf %266, %280 : vector<16x64xf32>
    %cst_135 = arith.constant 9.99999974E-6 : f32
    %282 = vector.broadcast %cst_135 : f32 to vector<16x1xf32>
    %283 = arith.addf %279, %282 : vector<16x1xf32>
    %284 = math.rsqrt %283 : vector<16x1xf32>
    %285 = vector.broadcast %284 : vector<16x1xf32> to vector<16x64xf32>
    %286 = arith.mulf %281, %285 : vector<16x64xf32>
    %287 = vector.broadcast %221 : vector<16x1xf32> to vector<16x64xf32>
    %288 = arith.mulf %286, %287 : vector<16x64xf32>
    %289 = vector.broadcast %222 : vector<16x1xf32> to vector<16x64xf32>
    %290 = arith.addf %288, %289 : vector<16x64xf32>
    %cst_136 = arith.constant 0.000000e+00 : f32
    %291 = vector.broadcast %cst_136 : f32 to vector<16x64xf32>
    %292 = arith.subf %291, %290 : vector<16x64xf32>
    %293 = math.exp %292 : vector<16x64xf32>
    %cst_137 = arith.constant 1.000000e+00 : f32
    %294 = vector.broadcast %cst_137 : f32 to vector<16x64xf32>
    %295 = arith.addf %294, %293 : vector<16x64xf32>
    %cst_138 = arith.constant 1.000000e+00 : f32
    %296 = vector.broadcast %cst_138 : f32 to vector<16x64xf32>
    %297 = arith.divf %296, %295 : vector<16x64xf32>
    %cst_139 = arith.constant 1.200000e+01 : f32
    %298 = vector.broadcast %cst_139 : f32 to vector<16x64xf32>
    %299 = arith.mulf %298, %297 : vector<16x64xf32>
    %300 = math.exp %299 : vector<16x64xf32>
    %301 = arith.mulf %219, %300 : vector<16x64xf32>
    %cst_140 = arith.constant dense<0.000000e+00> : vector<16x16xf32>
    %302 = tpu.matmul %301, %223, %cst_140 {dimension_numbers = #tpu.dot_dimension_numbers<[1], [0], [0], [1], [0, 0, 1, 1], [], []>} : vector<16x64xf32>, vector<64x16xf32>, vector<16x16xf32> -> vector<16x16xf32>
    %cst_141 = arith.constant dense<0.000000e+00> : vector<16x16xf32>
    %303 = tpu.matmul %300, %223, %cst_141 {dimension_numbers = #tpu.dot_dimension_numbers<[1], [0], [0], [1], [0, 0, 1, 1], [], []>} : vector<16x64xf32>, vector<64x16xf32>, vector<16x16xf32> -> vector<16x16xf32>
    %304 = tpu.reciprocal %303 {approx = true} : vector<16x16xf32> -> vector<16x16xf32>
    %305 = arith.mulf %302, %304 : vector<16x16xf32>
    %306 = vector.extract_strided_slice %2 {offsets = [0, 0], sizes = [1, 16], strides = [1, 1]} : vector<2x16xf32> to vector<1x16xf32>
    %307 = vector.extract_strided_slice %2 {offsets = [1, 0], sizes = [1, 16], strides = [1, 1]} : vector<2x16xf32> to vector<1x16xf32>
    %cst_142 = arith.constant 0.000000e+00 : f32
    %308 = vector.broadcast %cst_142 : f32 to vector<144x16xf32>
    %c0_143 = arith.constant 0 : index
    %c0_144 = arith.constant 0 : index
    %309 = vector.load %arg21[%c0_143, %c0_144] : memref<144x16xf32, #tpu.memory_space<vmem>>, vector<144x16xf32>
    tpu.vector_store %arg21[%c0_143, %c0_144], %308 {strides = array<i32>} : memref<144x16xf32, #tpu.memory_space<vmem>>, vector<144x16xf32>,
    %310 = vector.extract_strided_slice %305 {offsets = [0, 0], sizes = [16, 11], strides = [1, 1]} : vector<16x16xf32> to vector<16x11xf32>
    %311 = vector.extract_strided_slice %306 {offsets = [0, 5], sizes = [1, 11], strides = [1, 1]} : vector<1x16xf32> to vector<1x11xf32>
    %312 = vector.broadcast %311 : vector<1x11xf32> to vector<16x11xf32>
    %313 = arith.mulf %310, %312 : vector<16x11xf32>
    %c0_145 = arith.constant 0 : index
    %c5 = arith.constant 5 : index
    %314 = vector.load %arg21[%c0_145, %c5] : memref<144x16xf32, #tpu.memory_space<vmem>>, vector<16x11xf32>
    tpu.vector_store %arg21[%c0_145, %c5], %313 {strides = array<i32>} : memref<144x16xf32, #tpu.memory_space<vmem>>, vector<16x11xf32>,
    %315 = vector.extract_strided_slice %305 {offsets = [0, 0], sizes = [16, 12], strides = [1, 1]} : vector<16x16xf32> to vector<16x12xf32>
    %c16_146 = arith.constant 16 : index
    %c4_147 = arith.constant 4 : index
    %316 = vector.load %arg21[%c16_146, %c4_147] : memref<144x16xf32, #tpu.memory_space<vmem>>, vector<16x12xf32>
    tpu.vector_store %arg21[%c16_146, %c4_147], %315 {strides = array<i32>} : memref<144x16xf32, #tpu.memory_space<vmem>>, vector<16x12xf32>,
    %317 = vector.extract_strided_slice %305 {offsets = [0, 0], sizes = [16, 13], strides = [1, 1]} : vector<16x16xf32> to vector<16x13xf32>
    %318 = vector.extract_strided_slice %307 {offsets = [0, 3], sizes = [1, 13], strides = [1, 1]} : vector<1x16xf32> to vector<1x13xf32>
    %319 = vector.broadcast %318 : vector<1x13xf32> to vector<16x13xf32>
    %320 = arith.mulf %317, %319 : vector<16x13xf32>
    %c32_148 = arith.constant 32 : index
    %c3 = arith.constant 3 : index
    %321 = vector.load %arg21[%c32_148, %c3] : memref<144x16xf32, #tpu.memory_space<vmem>>, vector<16x13xf32>
    tpu.vector_store %arg21[%c32_148, %c3], %320 {strides = array<i32>} : memref<144x16xf32, #tpu.memory_space<vmem>>, vector<16x13xf32>,
    %322 = vector.extract_strided_slice %305 {offsets = [0, 0], sizes = [16, 15], strides = [1, 1]} : vector<16x16xf32> to vector<16x15xf32>
    %323 = vector.extract_strided_slice %306 {offsets = [0, 1], sizes = [1, 15], strides = [1, 1]} : vector<1x16xf32> to vector<1x15xf32>
    %324 = vector.broadcast %323 : vector<1x15xf32> to vector<16x15xf32>
    %325 = arith.mulf %322, %324 : vector<16x15xf32>
    %c48_149 = arith.constant 48 : index
    %c1_150 = arith.constant 1 : index
    %326 = vector.load %arg21[%c48_149, %c1_150] : memref<144x16xf32, #tpu.memory_space<vmem>>, vector<16x15xf32>
    tpu.vector_store %arg21[%c48_149, %c1_150], %325 {strides = array<i32>} : memref<144x16xf32, #tpu.memory_space<vmem>>, vector<16x15xf32>,
    %c64_151 = arith.constant 64 : index
    %c0_152 = arith.constant 0 : index
    %327 = vector.load %arg21[%c64_151, %c0_152] : memref<144x16xf32, #tpu.memory_space<vmem>>, vector<16x16xf32>
    tpu.vector_store %arg21[%c64_151, %c0_152], %305 {strides = array<i32>} : memref<144x16xf32, #tpu.memory_space<vmem>>, vector<16x16xf32>,
    %328 = vector.extract_strided_slice %305 {offsets = [0, 1], sizes = [16, 15], strides = [1, 1]} : vector<16x16xf32> to vector<16x15xf32>
    %329 = vector.extract_strided_slice %307 {offsets = [0, 0], sizes = [1, 15], strides = [1, 1]} : vector<1x16xf32> to vector<1x15xf32>
    %330 = vector.broadcast %329 : vector<1x15xf32> to vector<16x15xf32>
    %331 = arith.mulf %328, %330 : vector<16x15xf32>
    %c80_153 = arith.constant 80 : index
    %c0_154 = arith.constant 0 : index
    %332 = vector.load %arg21[%c80_153, %c0_154] : memref<144x16xf32, #tpu.memory_space<vmem>>, vector<16x15xf32>
    tpu.vector_store %arg21[%c80_153, %c0_154], %331 {strides = array<i32>} : memref<144x16xf32, #tpu.memory_space<vmem>>, vector<16x15xf32>,
    %333 = vector.extract_strided_slice %305 {offsets = [0, 3], sizes = [16, 13], strides = [1, 1]} : vector<16x16xf32> to vector<16x13xf32>
    %334 = vector.extract_strided_slice %306 {offsets = [0, 0], sizes = [1, 13], strides = [1, 1]} : vector<1x16xf32> to vector<1x13xf32>
    %335 = vector.broadcast %334 : vector<1x13xf32> to vector<16x13xf32>
    %336 = arith.mulf %333, %335 : vector<16x13xf32>
    %c96_155 = arith.constant 96 : index
    %c0_156 = arith.constant 0 : index
    %337 = vector.load %arg21[%c96_155, %c0_156] : memref<144x16xf32, #tpu.memory_space<vmem>>, vector<16x13xf32>
    tpu.vector_store %arg21[%c96_155, %c0_156], %336 {strides = array<i32>} : memref<144x16xf32, #tpu.memory_space<vmem>>, vector<16x13xf32>,
    %338 = vector.extract_strided_slice %305 {offsets = [0, 4], sizes = [16, 12], strides = [1, 1]} : vector<16x16xf32> to vector<16x12xf32>
    %c112_157 = arith.constant 112 : index
    %c0_158 = arith.constant 0 : index
    %339 = vector.load %arg21[%c112_157, %c0_158] : memref<144x16xf32, #tpu.memory_space<vmem>>, vector<16x12xf32>
    tpu.vector_store %arg21[%c112_157, %c0_158], %338 {strides = array<i32>} : memref<144x16xf32, #tpu.memory_space<vmem>>, vector<16x12xf32>,
    %340 = vector.extract_strided_slice %305 {offsets = [0, 5], sizes = [16, 11], strides = [1, 1]} : vector<16x16xf32> to vector<16x11xf32>
    %341 = vector.extract_strided_slice %307 {offsets = [0, 0], sizes = [1, 11], strides = [1, 1]} : vector<1x16xf32> to vector<1x11xf32>
    %342 = vector.broadcast %341 : vector<1x11xf32> to vector<16x11xf32>
    %343 = arith.mulf %340, %342 : vector<16x11xf32>
    %c128_159 = arith.constant 128 : index
    %c0_160 = arith.constant 0 : index
    %344 = vector.load %arg21[%c128_159, %c0_160] : memref<144x16xf32, #tpu.memory_space<vmem>>, vector<16x11xf32>
    tpu.vector_store %arg21[%c128_159, %c0_160], %343 {strides = array<i32>} : memref<144x16xf32, #tpu.memory_space<vmem>>, vector<16x11xf32>,
    %c0_161 = arith.constant 0 : index
    %c0_162 = arith.constant 0 : index
    %345 = vector.load %arg21[%c0_161, %c0_162] : memref<144x16xf32, #tpu.memory_space<vmem>>, vector<144x16xf32>
    %346 = arith.truncf %345 : vector<144x16xf32> to vector<144x16xbf16>
    %cst_163 = arith.constant dense<0.000000e+00> : vector<32x16xf32>
    %347 = tpu.matmul %224, %346, %cst_163 {dimension_numbers = #tpu.dot_dimension_numbers<[1], [0], [0], [1], [0, 0, 1, 1], [], []>} : vector<32x144xbf16>, vector<144x16xbf16>, vector<32x16xf32> -> vector<32x16xf32>
    %cst_164 = arith.constant dense<0.000000e+00> : vector<32xf32>
    %348 = vector.multi_reduction <add>, %347, %cst_164 [1] : vector<32x16xf32> to vector<32xf32>
    %349 = vector.shape_cast %348 : vector<32xf32> to vector<32x1xf32>
    %cst_165 = arith.constant 6.250000e-02 : f32
    %350 = vector.broadcast %cst_165 : f32 to vector<32x1xf32>
    %351 = arith.mulf %349, %350 : vector<32x1xf32>
    %352 = arith.mulf %347, %347 : vector<32x16xf32>
    %cst_166 = arith.constant dense<0.000000e+00> : vector<32xf32>
    %353 = vector.multi_reduction <add>, %352, %cst_166 [1] : vector<32x16xf32> to vector<32xf32>
    %354 = vector.shape_cast %353 : vector<32xf32> to vector<32x1xf32>
    %cst_167 = arith.constant 6.250000e-02 : f32
    %355 = vector.broadcast %cst_167 : f32 to vector<32x1xf32>
    %356 = arith.mulf %354, %355 : vector<32x1xf32>
    %357 = arith.mulf %351, %351 : vector<32x1xf32>
    %358 = arith.subf %356, %357 : vector<32x1xf32>
    %cst_168 = arith.constant 0.000000e+00 : f32
    %359 = vector.broadcast %cst_168 : f32 to vector<32x1xf32>
    %360 = arith.maximumf %358, %359 : vector<32x1xf32>
    %361 = vector.broadcast %351 : vector<32x1xf32> to vector<32x16xf32>
    %362 = arith.subf %347, %361 : vector<32x16xf32>
    %cst_169 = arith.constant 9.99999974E-6 : f32
    %363 = vector.broadcast %cst_169 : f32 to vector<32x1xf32>
    %364 = arith.addf %360, %363 : vector<32x1xf32>
    %365 = math.rsqrt %364 : vector<32x1xf32>
    %366 = vector.broadcast %365 : vector<32x1xf32> to vector<32x16xf32>
    %367 = arith.mulf %362, %366 : vector<32x16xf32>
    %c0_170 = arith.constant 0 : index
    %c0_171 = arith.constant 0 : index
    %c0_172 = arith.constant 0 : index
    %368 = vector.load %arg16[%c0_170, %c0_171, %c0_172] : memref<1x32x16xf32, #tpu.memory_space<vmem>>, vector<1x32x16xf32>
    %369 = vector.shape_cast %368 : vector<1x32x16xf32> to vector<32x16xf32>
    %370 = vector.shape_cast %367 : vector<32x16xf32> to vector<1x32x16xf32>
    tpu.vector_store %arg16[%c0_170, %c0_171, %c0_172], %370 {strides = array<i32>} : memref<1x32x16xf32, #tpu.memory_space<vmem>>, vector<1x32x16xf32>,
    return
  }
  func.func @transform_0(%arg0: i32) -> (i32, i32, i32) {
    %c0_i32 = arith.constant 0 : i32
    %c0_i32_0 = arith.constant 0 : i32
    %c0_i32_1 = arith.constant 0 : i32
    return %arg0, %c0_i32, %c0_i32_0 : i32, i32, i32
  }
  func.func @transform_1(%arg0: i32) -> (i32, i32) {
    %c0_i32 = arith.constant 0 : i32
    %c0_i32_0 = arith.constant 0 : i32
    %c0_i32_1 = arith.constant 0 : i32
    return %c0_i32, %c0_i32_0 : i32, i32
  }
  func.func @transform_2(%arg0: i32) -> (i32, i32) {
    %c0_i32 = arith.constant 0 : i32
    %c0_i32_0 = arith.constant 0 : i32
    %c0_i32_1 = arith.constant 0 : i32
    return %c0_i32, %c0_i32_0 : i32, i32
  }
  func.func @transform_3(%arg0: i32) -> (i32, i32) {
    %c0_i32 = arith.constant 0 : i32
    %c0_i32_0 = arith.constant 0 : i32
    %c0_i32_1 = arith.constant 0 : i32
    return %c0_i32, %c0_i32_0 : i32, i32
  }
  func.func @transform_4(%arg0: i32) -> (i32, i32) {
    %c0_i32 = arith.constant 0 : i32
    %c0_i32_0 = arith.constant 0 : i32
    %c0_i32_1 = arith.constant 0 : i32
    return %c0_i32, %c0_i32_0 : i32, i32
  }
  func.func @transform_5(%arg0: i32) -> (i32, i32) {
    %c0_i32 = arith.constant 0 : i32
    %c0_i32_0 = arith.constant 0 : i32
    %c0_i32_1 = arith.constant 0 : i32
    return %c0_i32, %c0_i32_0 : i32, i32
  }
  func.func @transform_6(%arg0: i32) -> (i32, i32) {
    %c0_i32 = arith.constant 0 : i32
    %c0_i32_0 = arith.constant 0 : i32
    %c0_i32_1 = arith.constant 0 : i32
    return %c0_i32, %c0_i32_0 : i32, i32
  }
  func.func @transform_7(%arg0: i32) -> (i32, i32) {
    %c0_i32 = arith.constant 0 : i32
    %c0_i32_0 = arith.constant 0 : i32
    %c0_i32_1 = arith.constant 0 : i32
    return %c0_i32, %c0_i32_0 : i32, i32
  }
  func.func @transform_8(%arg0: i32) -> (i32, i32) {
    %c0_i32 = arith.constant 0 : i32
    %c0_i32_0 = arith.constant 0 : i32
    %c0_i32_1 = arith.constant 0 : i32
    return %c0_i32, %c0_i32_0 : i32, i32
  }
  func.func @transform_9(%arg0: i32) -> (i32, i32) {
    %c0_i32 = arith.constant 0 : i32
    %c0_i32_0 = arith.constant 0 : i32
    %c0_i32_1 = arith.constant 0 : i32
    return %c0_i32, %c0_i32_0 : i32, i32
  }
  func.func @transform_10(%arg0: i32) -> (i32, i32) {
    %c0_i32 = arith.constant 0 : i32
    %c0_i32_0 = arith.constant 0 : i32
    %c0_i32_1 = arith.constant 0 : i32
    return %c0_i32, %c0_i32_0 : i32, i32
  }
  func.func @transform_11(%arg0: i32) -> (i32, i32) {
    %c0_i32 = arith.constant 0 : i32
    %c0_i32_0 = arith.constant 0 : i32
    %c0_i32_1 = arith.constant 0 : i32
    return %c0_i32, %c0_i32_0 : i32, i32
  }
  func.func @transform_12(%arg0: i32) -> (i32, i32) {
    %c0_i32 = arith.constant 0 : i32
    %c0_i32_0 = arith.constant 0 : i32
    %c0_i32_1 = arith.constant 0 : i32
    return %c0_i32, %c0_i32_0 : i32, i32
  }
  func.func @transform_13(%arg0: i32) -> (i32, i32) {
    %c0_i32 = arith.constant 0 : i32
    %c0_i32_0 = arith.constant 0 : i32
    %c0_i32_1 = arith.constant 0 : i32
    return %c0_i32, %c0_i32_0 : i32, i32
  }
  func.func @transform_14(%arg0: i32) -> (i32, i32) {
    %c0_i32 = arith.constant 0 : i32
    %c0_i32_0 = arith.constant 0 : i32
    %c0_i32_1 = arith.constant 0 : i32
    return %c0_i32, %c0_i32_0 : i32, i32
  }
  func.func @transform_15(%arg0: i32) -> (i32, i32, i32) {
    %c0_i32 = arith.constant 0 : i32
    %c0_i32_0 = arith.constant 0 : i32
    %c0_i32_1 = arith.constant 0 : i32
    return %arg0, %c0_i32, %c0_i32_0 : i32, i32, i32
  }
}

</mosaic_0001>

<bundles_post_ra>
// kernel: tpu_custom_call.1
= control target key start
LH: loop header
LB: loop body
LE: loop exit
PB: predicated region body
PF: predicated region fallthrough
CT: control target
= control target key end

     0   :  { %s2752_s18 = smov 0   ;;  %s3473_s0 = inlined_call_operand.vmem [shape: f32[2,4,256], index: 0, kind: input, shape index: {}]   ;;  %s3474_s1 = inlined_call_operand.vmem [shape: f32[2,256], index: 1, kind: input, shape index: {}]   ;;  %s3475_s2 = inlined_call_operand.vmem [shape: f32[2,64], index: 2, kind: input, shape index: {}]   ;;  %s3476_s3 = inlined_call_operand.vmem [shape: f32[2,16], index: 3, kind: input, shape index: {}]   ;;  %s3477_s4 = inlined_call_operand.vmem [shape: bf16[8,36], index: 4, kind: input, shape index: {}]   ;;  %s3478_s5 = inlined_call_operand.vmem [shape: bf16[8,72], index: 5, kind: input, shape index: {}]   ;;  %s3479_s6 = inlined_call_operand.vmem [shape: f32[8,1], index: 6, kind: input, shape index: {}]   ;;  %s3480_s7 = inlined_call_operand.vmem [shape: f32[8,1], index: 7, kind: input, shape index: {}]   ;;  %s3481_s8 = inlined_call_operand.vmem [shape: f32[256,64], index: 8, kind: input, shape index: {}]   ;;  %s3482_s9 = inlined_call_operand.vmem [shape: bf16[16,72], index: 9, kind: input, shape index: {}]   ;;  %s3483_s10 = inlined_call_operand.vmem [shape: bf16[16,144], index: 10, kind: input, shape index: {}]   ;;  %s3484_s11 = inlined_call_operand.vmem [shape: f32[16,1], index: 11, kind: input, shape index: {}]   ;;  %s3485_s12 = inlined_call_operand.vmem [shape: f32[16,1], index: 12, kind: input, shape index: {}]   ;;  %s3486_s13 = inlined_call_operand.vmem [shape: f32[64,16], index: 13, kind: input, shape index: {}]   ;;  %s3487_s14 = inlined_call_operand.vmem [shape: bf16[32,144], index: 14, kind: input, shape index: {}]   ;;  %s3488_s15 = inlined_call_operand.vmem [shape: f32[2,32,16], index: 15, kind: output, shape index: {}]  }
   0x1 LB: > { %s2271_s19 = sadd.s32 4294967295, %s2647_s18   ;;  %p2275_p0 = scmp.ge.s32.totalorder %s2647_s18, 1  ;;  %s2647_s18 = sphi %s2752_s18, %s25_s18  }
   0x2   : > { %p437_p1 = scmp.lt.s32.totalorder %s2647_s18, 3 }
   0x4   : > { %p438_p2 = pnand %p2275_p0, %p437_p1 }
   0x5   : > { %v512_v0 = vlaneseq (!%p438_p2)  ;;  %v496_v1 = vld [vmem:[%s3474_s1] sm:$0xf] (!%p438_p2)  ;;  %p485_p3 = scmp.lt.s32.totalorder (!%p438_p2), %s2271_s19, 1  ;;  %s2649_s23 = smov (!%p438_p2), 127   ;;  %vm559_vm0 = vcmask (!%p438_p2), 130048   ;;  %v2656_v19 = vmov (!%p438_p2), 0.0  }
   0x6   : > { %441 = sbr.rel (%p438_p2) target bundleno = 3408 (0xd50), region = 80  ;;  %s2650_s24 = smov (!%p438_p2), 111   ;;  %501 = vst [vmem:[#allocation2] sm:$0xff] (!%p438_p2), %v2656_v19  ;;  %502 = vst [vmem:[#allocation2 + $0x8] sm:$0xff] (!%p438_p2), %v2656_v19  ;;  %vm610_vm1 = vcmask (!%p438_p2), 1039360   ;;  %vm536_vm2 = vcmask (!%p438_p2), 908288  }
   0x7   : > { %v513_v2 = vshrl.u32 (!%p438_p2), %v512_v0, 7  ;;  %s2651_s28 = smov (!%p438_p2), 1   ;;  %s2652_s29 = smov (!%p438_p2), 113   ;;  %503 = vst [vmem:[#allocation2 + $0x10] sm:$0xff] (!%p438_p2), %v2656_v19  ;;  %504 = vst [vmem:[#allocation2 + $0x18] sm:$0xff] (!%p438_p2), %v2656_v19  ;;  %vm620_vm3 = vcmask (!%p438_p2), 7168  }
   0x8   : > { %s2653_s30 = smov (!%p438_p2), 15   ;;  %s2654_s16 = smov (!%p438_p2), 17   ;;  %505 = vst [vmem:[#allocation2 + $0x20] sm:$0xff] (!%p438_p2), %v2656_v19  ;;  %506 = vst [vmem:[#allocation2 + $0x28] sm:$0xff] (!%p438_p2), %v2656_v19  ;;  %vm590_vm4 = vcmask (!%p438_p2), 924672   ;;  %vm600_vm5 = vcmask (!%p438_p2), 121856  }
   0x9   : > { %v2763_v3 = vsub.s32 (!%p438_p2), 0, %v513_v2  ;;  %v518_v4 = vsub.s32 (!%p438_p2), 2, %v513_v2  ;;  %v2765_v5 = vsub.s32 (!%p438_p2), 1, %v513_v2  ;;  %v572_v6 = vsub.s32 (!%p438_p2), 3, %v513_v2  ;;  %s2655_s17 = smov (!%p438_p2), 16   ;;  %507 = vst [vmem:[#allocation2 + $0x30] sm:$0xff] (!%p438_p2), %v2656_v19 }
   0xa   : > { %508 = vst [vmem:[#allocation2 + $0x38] sm:$0xff] (!%p438_p2), %v2656_v19  ;;  %509 = vst [vmem:[#allocation2 + $0x40] sm:$0xf] (!%p438_p2), %v2656_v19  ;;  %s2657_s20 = smov (!%p438_p2), 112   ;;  %vm563_vm6 = vcmask (!%p438_p2), 1047684   ;;  %vm546_vm7 = vcmask (!%p438_p2), 138240  }
   0xb   : > { %v515_v7 = vrot.slane (!%p438_p2), %v496_v1, %v2763_v3  ;;  %v519_v8 = vrot.slane (!%p438_p2), %v496_v1, %v518_v4  ;;  %v569_v9 = vrot.slane (!%p438_p2), %v496_v1, %v2765_v5  ;;  %v573_v10 = vrot.slane (!%p438_p2), %v496_v1, %v572_v6  ;;  %510 = vst [vmem:[#allocation2 + $0x48] sm:$0xf] (!%p438_p2), %v2656_v19  ;;  %s2662_s21 = smov (!%p438_p2), 9   ;;  %s2667_s25 = smov (!%p438_p2), 125  }
   0xc   : > { %822 = vst [vmem:[#allocation3] sm:$0xff] (!%p438_p2), %v2656_v19  ;;  %824 = vst [vmem:[#allocation3 + $0x10] sm:$0xff] (!%p438_p2), %v2656_v19  ;;  %vm676_vm8 = vcmask (!%p438_p2), 916484   ;;  %vm671_vm9 = vcmask (!%p438_p2), 916480   ;;  %v2658_v57 = vmov (!%p438_p2), 0   ;;  %vm550_vm10 = vcmask (!%p438_p2), 1043592  }
   0xd   : > { %s3490_s19 = smov (!%p485_p3, %s2271_s19), 1  ;;  %v2772_v11 = vrot.slane %v515_v7, %v2763_v3  ;;  %v2775_v12 = vrot.slane %v519_v8, %v2763_v3  ;;  %v2778_v13 = vrot.slane %v569_v9, %v2765_v5  ;;  %v2781_v14 = vrot.slane %v573_v10, %v2765_v5  ;;  %826 = vst [vmem:[#allocation3 + $0x20] sm:$0xff] %v2656_v19  ;;  %s2668_s26 = smov 3  }
   0xe   : > { %s2301_s22 = sshll.u32 %s3490_s19, 3  ;;  %828 = vst [vmem:[#allocation3 + $0x30] sm:$0xff] %v2656_v19  ;;  %833 = vst [vmem:[#allocation3 + $0x58] sm:$0xff] %v2656_v19  ;;  %755 = vmatprep.mubr.bf16.mxu0 %v2658_v57  ;;  %2578 = vset.pattern.permute.xlu0 %v2658_v57  ;;  %vm647_vm11 = vcmask 1039364   ;;  %vm604_vm12 = vcmask 1043576   ;;  %vm624_vm13 = vcmask 1047564  }
   0xf   : > { %v532_v15 = vcombine.low %v2772_v11, %v2775_v12  ;;  %v586_v16 = vcombine.low %v2778_v13, %v2781_v14  ;;  %s489_s27 = scalar_lea.vmem %s3473_s0, %s2301_s22  ;;  %835 = vst [vmem:[#allocation3 + $0x68] sm:$0xff] %v2656_v19  ;;  %837 = vst [vmem:[#allocation3 + $0x78] sm:$0xff] %v2656_v19  ;;  %2579 = vset.pattern.permute.xlu1 %v2658_v57  ;;  %vm665_vm14 = vcmask 920576   ;;  %vm694_vm15 = vcmask 904192   ;;  %s2663_s22 = smov 8  }
  0x10   : > { %v2795_v17 = vld [vmem:[%s489_s27] sm:$0xff]  ;;  %839 = vst [vmem:[#allocation3 + $0x88] sm:$0xff] %v2656_v19  ;;  %1903 = vst.msk [vmem:[#allocation6] sm:$0xff] %vm559_vm0, %v2656_v19  ;;  %s2669_s27 = smov 5  }
  0x11   : > { %607 = vrot.lane.b32.xlu1 %v532_v15, %s2649_s23  ;;  %533 = vrot.lane.b32.xlu0 %v532_v15, %s2650_s24  ;;  %v554_v18 = vcombine.low %v2795_v17, %v2795_v17  ;;  %1904 = vst.msk [vmem:[#allocation6 + $0x8] sm:$0xff] %vm559_vm0, %v2656_v19  ;;  %1905 = vst.msk [vmem:[#allocation6 + $0x10] sm:$0xff] %vm559_vm0, %v2656_v19  ;;  %v627_v20 = vcombine.high %v2795_v17, %v2795_v17 }
  0x12   : > { %1906 = vst.msk [vmem:[#allocation6 + $0x18] sm:$0xff] %vm559_vm0, %v2656_v19  ;;  %1907 = vst.msk [vmem:[#allocation6 + $0x20] sm:$0xff] %vm559_vm0, %v2656_v19 }
  0x13   : > { %1908 = vst.msk [vmem:[#allocation6 + $0x28] sm:$0xff] %vm559_vm0, %v2656_v19  ;;  %1909 = vst.msk [vmem:[#allocation6 + $0x30] sm:$0xff] %vm559_vm0, %v2656_v19 }
  0x14   : > { %1910 = vst.msk [vmem:[#allocation6 + $0x38] sm:$0xff] %vm559_vm0, %v2656_v19  ;;  %1911 = vst.msk [vmem:[#allocation6 + $0x40] sm:$0xff] %vm559_vm0, %v2656_v19 }
  0x15   : > { %631 = vrot.lane.b32.xlu1 %v586_v16, %s2651_s28  ;;  %587 = vrot.lane.b32.xlu0 %v586_v16, %s2652_s29  ;;  %1912 = vst.msk [vmem:[#allocation6 + $0x48] sm:$0xff] %vm559_vm0, %v2656_v19  ;;  %1913 = vst.msk [vmem:[#allocation6 + $0x50] sm:$0xff] %vm559_vm0, %v2656_v19 }
  0x16   : > { %1914 = vst.msk [vmem:[#allocation6 + $0x58] sm:$0xff] %vm559_vm0, %v2656_v19  ;;  %1915 = vst.msk [vmem:[#allocation6 + $0x60] sm:$0xff] %vm559_vm0, %v2656_v19 }
  0x17   : > { %1916 = vst.msk [vmem:[#allocation6 + $0x68] sm:$0xff] %vm559_vm0, %v2656_v19  ;;  %1917 = vst.msk [vmem:[#allocation6 + $0x70] sm:$0xff] %vm559_vm0, %v2656_v19 }
  0x18   : > { %1918 = vst.msk [vmem:[#allocation6 + $0x78] sm:$0xff] %vm559_vm0, %v2656_v19  ;;  %1919 = vst.msk [vmem:[#allocation6 + $0x80] sm:$0xff] %vm559_vm0, %v2656_v19 }
  0x19   : > { %649 = vrot.lane.b32.xlu0 %v532_v15, %s2653_s30  ;;  %678 = vrot.lane.b32.xlu1 %v586_v16, %s2654_s16  ;;  %1920 = vst.msk [vmem:[#allocation6 + $0x88] sm:$0xff] %vm559_vm0, %v2656_v19  ;;  %629 = vst [vmem:[#allocation2 + $0x20] sm:$0xf] %v2795_v17 }
  0x1a   : > { %630 = vst [vmem:[#allocation2 + $0x28] sm:$0xf] %v627_v20 }
  0x1d   : > { %557 = vrot.lane.b32.xlu1 %v2795_v17, %s2655_s17  ;;  %555 = vrot.lane.b32.xlu0 %v554_v18, %s2655_s17 }
  0x21   : > { %669 = vrot.lane.b32.xlu1 %v2795_v17, %s2657_s20  ;;  %667 = vrot.lane.b32.xlu0 %v554_v18, %s2657_s20 }
  0x83   : > { %v608_v21 = vpop.permute.xlu1 %607  ;;  %v534_v22 = vpop.permute.xlu0 %533 }
  0x84   : > { %v609_v23 = vrot.slane %v608_v21, 4  ;;  %v535_v24 = vrot.slane %v534_v22, 4 }
  0x86   : > { %v611_v25 = vsel %vm610_vm1, %v608_v21, %v609_v23  ;;  %v537_v26 = vsel %vm536_vm2, %v534_v22, %v535_v24 }
  0x87   : > { %v632_v27 = vpop.permute.xlu1 %631  ;;  %v588_v28 = vpop.permute.xlu0 %587  ;;  %v613_v29 = vmul.f32 %v611_v25, %v2795_v17  ;;  %v539_v30 = vmul.f32 %v537_v26, %v2795_v17 }
  0x88   : > { %v633_v31 = vrot.slane %v632_v27, 4  ;;  %v589_v32 = vrot.slane %v588_v28, 4 }
  0x89   : > { %618 = vrot.lane.b32.xlu1 %v613_v29, %s2651_s28  ;;  %542 = vrot.lane.b32.xlu0 %v539_v30, %s2654_s16  ;;  %v541_v42 = vcombine.high %v539_v30, %v539_v30  ;;  %v615_v47 = vcombine.low %v613_v29, %v613_v29 }
  0x8a   : > { %v634_v33 = vsel %vm620_vm3, %v633_v31, %v632_v27  ;;  %v591_v34 = vsel %vm590_vm4, %v588_v28, %v589_v32 }
  0x8b   : > { %v650_v35 = vpop.permute.xlu0 %649  ;;  %v636_v36 = vmul.f32 %v634_v33, %v2795_v17  ;;  %v593_v37 = vmul.f32 %v591_v34, %v2795_v17  ;;  %v679_v38 = vpop.permute.xlu1 %678 }
  0x8c   : > { %v651_v39 = vrot.slane %v650_v35, 4  ;;  %v680_v45 = vrot.slane %v679_v38, 4 }
  0x8d   : > { %641 = vrot.lane.b32.xlu1 %v636_v36, %s2649_s23  ;;  %596 = vrot.lane.b32.xlu0 %v593_v37, %s2653_s30  ;;  %v595_v48 = vcombine.high %v593_v37, %v593_v37  ;;  %v638_v53 = vcombine.low %v636_v36, %v636_v36  ;;  %v499_v36 = vld [vmem:[%s3477_s4] sm:$0xf] }
  0x8e   : > { %v652_v40 = vsel %vm600_vm5, %v651_v39, %v650_v35  ;;  %v681_v51 = vsel %vm546_vm7, %v680_v45, %v679_v38 }
  0x8f   : > { %v654_v41 = vmul.f32 %v652_v40, %v2795_v17  ;;  %v558_v43 = vpop.permute.xlu1 %557  ;;  %v556_v44 = vpop.permute.xlu0 %555  ;;  %v683_v55 = vmul.f32 %v681_v51, %v2795_v17 }
  0x90   : > { %v560_v46 = vsel %vm559_vm0, %v556_v44, %v558_v43  ;;  %564 = vst.msk [vmem:[#allocation2] sm:$0xf0] %vm563_vm6, %v556_v44  ;;  %vm716_vm6 = vcmask 1041408  }
  0x91   : > { %657 = vrot.lane.b32.xlu0 %v654_v41, %s2652_s29  ;;  %544 = vrot.lane.b32.xlu1 %v541_v42, %s2654_s16  ;;  %565 = vst [vmem:[#allocation2 + $0x8] sm:$0xf0] %v560_v46  ;;  %v656_v54 = vcombine.high %v654_v41, %v654_v41  ;;  %v685_v56 = vcombine.high %v683_v55, %v683_v55 }
  0x93   : > { %v670_v49 = vpop.permute.xlu1 %669  ;;  %v668_v50 = vpop.permute.xlu0 %667 }
  0x94   : > { %677 = vst.msk [vmem:[#allocation2 + $0x38] sm:$0xf0] %vm676_vm8, %v670_v49  ;;  %v672_v52 = vsel %vm671_vm9, %v668_v50, %v670_v49  ;;  %vm712_vm8 = vcmask 293888  }
  0x95   : > { %616 = vrot.lane.b32.xlu0 %v615_v47, %s2651_s28  ;;  %598 = vrot.lane.b32.xlu1 %v595_v48, %s2653_s30  ;;  %675 = vst [vmem:[#allocation2 + $0x30] sm:$0xf0] %v672_v52 }
  0x99   : > { %639 = vrot.lane.b32.xlu0 %v638_v53, %s2649_s23  ;;  %659 = vrot.lane.b32.xlu1 %v656_v54, %s2652_s29 }
  0x9d   : > { %686 = vrot.lane.b32.xlu0 %v683_v55, %s2650_s24  ;;  %688 = vrot.lane.b32.xlu1 %v685_v56, %s2650_s24 }
  0xa1   : > { %842 = vrot.lane.b32.xlu1 %v2775_v12, %s2650_s24 }
  0xfb   : > { %v619_v58 = vpop.permute.xlu1 %618  ;;  %v543_v59 = vpop.permute.xlu0 %542 }
  0xfc   : > { %551 = vst.msk [vmem:[#allocation2] sm:$0xf] %vm550_vm10, %v543_v59  ;;  %vm870_vm10 = vcmask 1047680  }
  0xff   : > { %v642_v60 = vpop.permute.xlu1 %641  ;;  %v597_v61 = vpop.permute.xlu0 %596 }
 0x100   : > { %648 = vst.msk [vmem:[#allocation2 + $0x28] sm:$0xf0] %vm647_vm11, %v642_v60  ;;  %vm858_vm11 = vcmask 1047688  }
 0x101   : > { %605 = vst.msk [vmem:[#allocation2 + $0x10] sm:$0xf] %vm604_vm12, %v597_v61  ;;  %vm891_vm12 = vcmask 1047672  }
 0x103   : > { %v658_v62 = vpop.permute.xlu0 %657  ;;  %v545_v63 = vpop.permute.xlu1 %544  ;;  %v696_v23 = vld [vmem:[#allocation2] sm:$0xff] }
 0x104   : > { %v547_v0 = vsel %vm546_vm7, %v543_v59, %v545_v63 }
 0x105   : > { %552 = vst [vmem:[#allocation2 + $0x8] sm:$0xf] %v547_v0 }
 0x107   : > { %v617_v1 = vpop.permute.xlu0 %616  ;;  %v599_v2 = vpop.permute.xlu1 %598  ;;  %v701_v25 = vld [vmem:[#allocation2 + $0x28] sm:$0xff] }
 0x108   : > { %v621_v4 = vsel %vm620_vm3, %v617_v1, %v619_v58  ;;  %625 = vst.msk [vmem:[#allocation2 + $0x10] sm:$0xf0] %vm624_vm13, %v617_v1  ;;  %v601_v6 = vsel %vm600_vm5, %v597_v61, %v599_v2  ;;  %vm912_vm13 = vcmask 1047560  }
 0x109   : > { %626 = vst [vmem:[#allocation2 + $0x18] sm:$0xf0] %v621_v4  ;;  %606 = vst [vmem:[#allocation2 + $0x18] sm:$0xf] %v601_v6 }
 0x10b   : > { %v640_v7 = vpop.permute.xlu0 %639  ;;  %v660_v8 = vpop.permute.xlu1 %659 }
 0x10c   : > { %v643_v9 = vsel %vm610_vm1, %v640_v7, %v642_v60  ;;  %v661_v10 = vsel %vm590_vm4, %v658_v62, %v660_v8  ;;  %666 = vst.msk [vmem:[#allocation2 + $0x38] sm:$0xf] %vm665_vm14, %v660_v8  ;;  %v697_v20 = vld [vmem:[#allocation2 + $0x8] sm:$0xff]  ;;  %vm1315_vm14 = vcmask 523272  }
 0x10d   : > { %646 = vst [vmem:[#allocation2 + $0x20] sm:$0xf0] %v643_v9  ;;  %664 = vst [vmem:[#allocation2 + $0x30] sm:$0xf] %v661_v10 }
 0x10f   : > { %v687_v15 = vpop.permute.xlu0 %686  ;;  %v689_v16 = vpop.permute.xlu1 %688  ;;  %v698_v17 = vld [vmem:[#allocation2 + $0x10] sm:$0xff] }
 0x110   : > { %v690_v18 = vsel %vm536_vm2, %v687_v15, %v689_v16  ;;  %695 = vst.msk [vmem:[#allocation2 + $0x48] sm:$0xf] %vm694_vm15, %v689_v16  ;;  %v699_v21 = vld [vmem:[#allocation2 + $0x18] sm:$0xff]  ;;  %v706_v24 = vpack.c.bf16 %v698_v17, %v696_v23  ;;  %vm1305_vm15 = vcmask 523320  }
 0x111   : > { %693 = vst [vmem:[#allocation2 + $0x40] sm:$0xf] %v690_v18  ;;  %v707_v22 = vpack.c.bf16 %v699_v21, %v697_v20 }
 0x113   : > { %723 = vmatprep.subr.bf16.mxu0 %v707_v22  ;;  %v703_v26 = vld [vmem:[#allocation2 + $0x38] sm:$0xff]  ;;  %v843_v45 = vpop.permute.xlu1 %842 }
 0x114   : > { %724 = vmatpush1.bf16.msra.mxu0 %v706_v24  ;;  %v709_v27 = vpack.c.bf16 %v703_v26, %v701_v25  ;;  %v700_v28 = vld [vmem:[#allocation2 + $0x20] sm:$0xff]  ;;  %v702_v29 = vld [vmem:[#allocation2 + $0x30] sm:$0xff] }
 0x115   : > { %v708_v30 = vpack.c.bf16 %v702_v29, %v700_v28 }
 0x116   : > { %725 = vmatprep.subr.bf16.mxu0 %v709_v27 }
 0x117   : > { %v705_v31 = vld [vmem:[#allocation2 + $0x48] sm:$0xf] }
 0x118   : > { %726 = vmatpush1.bf16.msra.mxu0 %v708_v30  ;;  %v711_v32 = vpack.c.bf16 %v705_v31, %v705_v31  ;;  %v704_v33 = vld [vmem:[#allocation2 + $0x40] sm:$0xf] }
 0x119   : > { %v710_v34 = vpack.c.bf16 %v704_v33, %v704_v33 }
 0x11a   : > { %2280 = vmatprep.subr.msk.bf16.mxu0 %vm716_vm6, %v711_v32 }
 0x11b   : > { %v718_v35 = vsel %vm716_vm6, %v710_v34, 0  ;;  %vm1336_vm6 = vcmask 465920  }
 0x11c   : > { %728 = vmatpush1.bf16.msra.mxu0 %v718_v35 }
 0x11f   : > { %2281 = vmatmul.mubr.msk.bf16.vlgmr.msra.gmra.mrb[0].mxu0 %vm712_vm8, %v499_v36  ;;  %vm1326_vm8 = vcmask 515072  }
 0x120   : > { %1057 = vmatprep.mubr.bf16.mxu0 %v2658_v57 }
 0x1f2   : > { %v757_v37 = vpop.f32.mrb[0].mxu0 }
 0x1f3   : > { %v759_v38 = vpop.f32.mrb[1].mxu0  ;;  %v768_v39 = vmul.f32 %v757_v37, %v757_v37 }
 0x1f4   : > { %v761_v40 = vpop.f32.mrb[2].mxu0  ;;  %v764_v41 = vadd.f32 %v759_v38, %v757_v37  ;;  %v769_v42 = vmul.f32 %v759_v38, %v759_v38 }
 0x1f5   : > { %v762_v43 = vpop.f32.mrb[3].mxu0 }
 0x1f6   : > { %765 = vadd.xlane.f32.xlu0 %v764_v41  ;;  %v770_v44 = vadd.f32 %v769_v42, %v768_v39 }
 0x1f8   : > { %771 = vadd.xlane.f32.xlu1 %v770_v44 }
 0x209   : > { %875 = vrot.lane.b32.xlu1 %v2781_v14, %s2652_s29 }
 0x20c   : > { %840 = vrot.lane.b32.xlu0 %v2772_v11, %s2650_s24 }
 0x20d   : > { %896 = vrot.lane.b32.xlu1 %v2775_v12, %s2649_s23 }
 0x210   : > { %873 = vrot.lane.b32.xlu0 %v2778_v13, %s2652_s29 }
 0x211   : > { %919 = vrot.lane.b32.xlu1 %v2781_v14, %s2651_s28 }
 0x214   : > { %894 = vrot.lane.b32.xlu0 %v2772_v11, %s2649_s23 }
 0x215   : > { %939 = vrot.lane.b32.xlu1 %v2775_v12, %s2653_s30 }
 0x218   : > { %917 = vrot.lane.b32.xlu0 %v2778_v13, %s2651_s28 }
 0x219   : > { %968 = vrot.lane.b32.xlu1 %v2781_v14, %s2654_s16 }
 0x21c   : > { %937 = vrot.lane.b32.xlu0 %v2772_v11, %s2653_s30 }
 0x220   : > { %966 = vrot.lane.b32.xlu0 %v2778_v13, %s2654_s16 }
 0x283   : > { %v766_v46 = vpop.xlane.xlu0 %765 }
 0x284   : > { %v767_v47 = vmul.f32 0.00390625, %v766_v46 }
 0x285   : > { %v772_v48 = vpop.xlane.xlu1 %771 }
 0x286   : > { %v774_v49 = vmul.f32 %v767_v47, %v767_v47  ;;  %v773_v50 = vmul.f32 0.00390625, %v772_v48  ;;  %v777_v54 = vsub.f32 %v757_v37, %v767_v47  ;;  %v778_v55 = vsub.f32 %v759_v38, %v767_v47 }
 0x287   : > { %v841_v53 = vpop.permute.xlu0 %840 }
 0x288   : > { %v775_v51 = vsub.f32 %v773_v50, %v774_v49  ;;  %v844_v63 = vsel %vm536_vm2, %v841_v53, %v843_v45 }
 0x289   : > { %v876_v59 = vpop.permute.xlu1 %875 }
 0x28a   : > { %v776_v12 = vmax.f32 %v775_v51, 0.0 }
 0x28b   : > { %v874_v11 = vpop.permute.xlu0 %873 }
 0x28c   : > { %v779_v52 = vadd.f32 1e-05, %v776_v12  ;;  %v877_v2 = vsel %vm590_vm4, %v874_v11, %v876_v59 }
 0x28d   : > { %v897_v62 = vpop.permute.xlu1 %896 }
 0x28e   : > { %2591 = vrsqrt.f32 %v779_v52 }
 0x28f   : > { %v895_v61 = vpop.permute.xlu0 %894 }
 0x290   : > { %v898_v9 = vsel %vm610_vm1, %v895_v61, %v897_v62 }
 0x291   : > { %v920_v6 = vpop.permute.xlu1 %919 }
 0x293   : > { %v918_v4 = vpop.permute.xlu0 %917 }
 0x294   : > { %v921_v17 = vsel %vm620_vm3, %v918_v4, %v920_v6 }
 0x295   : > { %v940_v16 = vpop.permute.xlu1 %939 }
 0x297   : > { %v938_v15 = vpop.permute.xlu0 %937 }
 0x298   : > { %v2592_v14 = vpop.eup %2591  ;;  %v941_v22 = vsel %vm600_vm5, %v938_v15, %v940_v16 }
 0x299   : > { %v781_v56 = vmul.f32 %v2592_v14, %v777_v54  ;;  %v782_v58 = vmul.f32 %v2592_v14, %v778_v55  ;;  %v969_v24 = vpop.permute.xlu1 %968 }
 0x29b   : > { %v2927_v60 = vmax.f32 %v781_v56, 0.0  ;;  %v2929_v13 = vmax.f32 %v782_v58, 0.0  ;;  %v967_v23 = vpop.permute.xlu0 %966 }
 0x29c   : > { %v970_v27 = vsel %vm546_vm7, %v967_v23, %v969_v24  ;;  %v787_v24 = vld [vmem:[%s3480_s7] sm:$0xff] }
 0x29d   : > { %865 = vrot.lane.b32.xlu1 %v2929_v13, %s2655_s17  ;;  %863 = vrot.lane.b32.xlu0 %v2927_v60, %s2655_s17  ;;  %v848_v0 = vmul.f32 %v843_v45, %v2929_v13  ;;  %v847_v1 = vmul.f32 %v844_v63, %v2927_v60  ;;  %v881_v7 = vmul.f32 %v876_v59, %v2929_v13  ;;  %s2660_s17 = smov 121  }
 0x29e   : > { %v880_v8 = vmul.f32 %v877_v2, %v2927_v60  ;;  %v902_v10 = vmul.f32 %v897_v62, %v2929_v13  ;;  %v901_v18 = vmul.f32 %v898_v9, %v2927_v60  ;;  %v925_v20 = vmul.f32 %v921_v17, %v2929_v13 }
 0x29f   : > { %v924_v21 = vmul.f32 %v918_v4, %v2927_v60  ;;  %v945_v25 = vmul.f32 %v941_v22, %v2929_v13  ;;  %v944_v26 = vmul.f32 %v938_v15, %v2927_v60  ;;  %v974_v28 = vmul.f32 %v970_v27, %v2929_v13  ;;  %v805_v27 = vld [vmem:[%s3481_s8 + $0x88] sm:$0xff] }
 0x2a0   : > { %v973_v29 = vmul.f32 %v967_v23, %v2927_v60 }
 0x2a1   : > { %959 = vrot.lane.b32.xlu1 %v2929_v13, %s2657_s20  ;;  %957 = vrot.lane.b32.xlu0 %v2927_v60, %s2657_s20  ;;  %s2661_s20 = smov 7  }
 0x2a5   : > { %853 = vrot.lane.b32.xlu1 %v848_v0, %s2654_s16  ;;  %851 = vrot.lane.b32.xlu0 %v847_v1, %s2654_s16  ;;  %s2659_s16 = smov 119  }
 0x2a9   : > { %886 = vrot.lane.b32.xlu1 %v881_v7, %s2653_s30  ;;  %884 = vrot.lane.b32.xlu0 %v880_v8, %s2653_s30  ;;  %s2671_s30 = smov 124  }
 0x2ad   : > { %907 = vrot.lane.b32.xlu1 %v902_v10, %s2651_s28  ;;  %905 = vrot.lane.b32.xlu0 %v901_v18, %s2651_s28  ;;  %v785_v10 = vld [vmem:[%s3478_s5] sm:$0xf] }
 0x2b1   : > { %930 = vrot.lane.b32.xlu1 %v925_v20, %s2649_s23  ;;  %928 = vrot.lane.b32.xlu0 %v924_v21, %s2649_s23 }
 0x2b5   : > { %950 = vrot.lane.b32.xlu1 %v945_v25, %s2652_s29  ;;  %948 = vrot.lane.b32.xlu0 %v944_v26, %s2652_s29  ;;  %v786_v25 = vld [vmem:[%s3479_s6] sm:$0xff]  ;;  %s2670_s29 = smov 4  }
 0x2b6   : > { %v804_v26 = vld [vmem:[%s3481_s8 + $0x80] sm:$0xff] }
 0x2b9   : > { %979 = vrot.lane.b32.xlu1 %v974_v28, %s2650_s24  ;;  %977 = vrot.lane.b32.xlu0 %v973_v29, %s2650_s24  ;;  %v2451_v28 = vpack.c.bf16 %v805_v27, %v804_v26  ;;  %v788_v29 = vld [vmem:[%s3481_s8] sm:$0xff]  ;;  %s2664_s24 = smov 120  }
 0x2bb   : > { %2484 = vmatprep.subr.bf16.mxu1 %v2451_v28 }
 0x30f   : > { %v866_v30 = vpop.permute.xlu1 %865  ;;  %v864_v31 = vpop.permute.xlu0 %863 }
 0x310   : > { %871 = vst.msk [vmem:[#allocation3 + $0x10] sm:$0xff] %vm870_vm10, %v864_v31  ;;  %v867_v32 = vsel %vm559_vm0, %v864_v31, %v866_v30  ;;  %v789_v30 = vld [vmem:[%s3481_s8 + $0x8] sm:$0xff]  ;;  %vm1351_vm10 = vcmask 449536  }
 0x311   : > { %v2453_v31 = vpack.c.bf16 %v789_v30, %v788_v29 }
 0x313   : > { %v960_v33 = vpop.permute.xlu1 %959  ;;  %v958_v34 = vpop.permute.xlu0 %957  ;;  %2486 = vmatpush3.bf16.msra.mxu1 %v2453_v31 }
 0x314   : > { %965 = vst.msk [vmem:[#allocation3 + $0x78] sm:$0xff] %vm671_vm9, %v960_v33  ;;  %v961_v35 = vsel %vm671_vm9, %v958_v34, %v960_v33  ;;  %v807_v33 = vld [vmem:[%s3481_s8 + $0x98] sm:$0xff]  ;;  %vm1284_vm9 = vcmask 523336  }
 0x317   : > { %v854_v36 = vpop.permute.xlu1 %853  ;;  %v852_v37 = vpop.permute.xlu0 %851  ;;  %v988_v46 = vld [vmem:[#allocation3 + $0x10] sm:$0xff] }
 0x318   : > { %859 = vst.msk [vmem:[#allocation3] sm:$0xff] %vm858_vm11, %v852_v37  ;;  %v855_v38 = vsel %vm546_vm7, %v852_v37, %v854_v36  ;;  %v791_v36 = vld [vmem:[%s3481_s8 + $0x18] sm:$0xff]  ;;  %vm1290_vm7 = vcmask 523328   ;;  %vm1341_vm11 = vcmask 457728  }
 0x319   : > { %v1005_v39 = vpack.c.bf16 %v867_v32, %v855_v38  ;;  %v806_v32 = vld [vmem:[%s3481_s8 + $0x90] sm:$0xff]  ;;  %v808_v38 = vld [vmem:[%s3481_s8 + $0xa0] sm:$0xff] }
 0x31a   : > { %v2455_v34 = vpack.c.bf16 %v807_v33, %v806_v32 }
 0x31b   : > { %v887_v40 = vpop.permute.xlu1 %886  ;;  %v885_v41 = vpop.permute.xlu0 %884  ;;  %1025 = vmatprep.subr.bf16.mxu0 %v1005_v39  ;;  %v1001_v1 = vld [vmem:[#allocation3 + $0x78] sm:$0xff] }
 0x31c   : > { %892 = vst.msk [vmem:[#allocation3 + $0x20] sm:$0xff] %vm891_vm12, %v885_v41  ;;  %v888_v42 = vsel %vm600_vm5, %v885_v41, %v887_v40  ;;  %2488 = vmatprep.subr.bf16.mxu1 %v2455_v34  ;;  %v809_v39 = vld [vmem:[%s3481_s8 + $0xa8] sm:$0xff]  ;;  %v792_v41 = vld [vmem:[%s3481_s8 + $0x20] sm:$0xff]  ;;  %vm1939_vm12 = vcmask 130088  }
 0x31d   : > { %v2459_v40 = vpack.c.bf16 %v809_v39, %v808_v38 }
 0x31f   : > { %v908_v43 = vpop.permute.xlu1 %907  ;;  %v906_v44 = vpop.permute.xlu0 %905  ;;  %v986_v45 = vld [vmem:[#allocation3] sm:$0xff] }
 0x320   : > { %913 = vst.msk [vmem:[#allocation3 + $0x30] sm:$0xff] %vm912_vm13, %v906_v44  ;;  %v909_v47 = vsel %vm620_vm3, %v906_v44, %v908_v43  ;;  %v1004_v48 = vpack.c.bf16 %v988_v46, %v986_v45  ;;  %v810_v44 = vld [vmem:[%s3481_s8 + $0xb0] sm:$0xff]  ;;  %v811_v45 = vld [vmem:[%s3481_s8 + $0xb8] sm:$0xff]  ;;  %vm1261_vm3 = vcmask 523264   ;;  %vm1950_vm13 = vcmask 130080  }
 0x321   : > { %v1007_v49 = vpack.c.bf16 %v909_v47, %v888_v42  ;;  %v793_v42 = vld [vmem:[%s3481_s8 + $0x28] sm:$0xff]  ;;  %v2463_v46 = vpack.c.bf16 %v811_v45, %v810_v44  ;;  %v794_v47 = vld [vmem:[%s3481_s8 + $0x30] sm:$0xff]  ;;  %1263 = vst.msk [vmem:[#allocation4 + $0x8] sm:$0xff] %vm1261_vm3, %v2656_v19  ;;  %1262 = vst.msk [vmem:[#allocation4] sm:$0xff] %vm1261_vm3, %v2656_v19 }
 0x322   : > { %1026 = vmatpush1.bf16.msra.mxu0 %v1004_v48  ;;  %v2461_v43 = vpack.c.bf16 %v793_v42, %v792_v41  ;;  %v795_v48 = vld [vmem:[%s3481_s8 + $0x38] sm:$0xff]  ;;  %1264 = vst.msk [vmem:[#allocation4 + $0x10] sm:$0xff] %vm1261_vm3, %v2656_v19  ;;  %1265 = vst.msk [vmem:[#allocation4 + $0x18] sm:$0xff] %vm1261_vm3, %v2656_v19 }
 0x323   : > { %v931_v50 = vpop.permute.xlu1 %930  ;;  %v929_v51 = vpop.permute.xlu0 %928  ;;  %1027 = vmatprep.subr.bf16.mxu0 %v1007_v49  ;;  %v990_v54 = vld [vmem:[#allocation3 + $0x20] sm:$0xff]  ;;  %v2465_v49 = vpack.c.bf16 %v795_v48, %v794_v47  ;;  %1266 = vst.msk [vmem:[#allocation4 + $0x20] sm:$0xff] %vm1261_vm3, %v2656_v19  ;;  %1267 = vst.msk [vmem:[#allocation4 + $0x28] sm:$0xff] %vm1261_vm3, %v2656_v19 }
 0x324   : > { %936 = vst.msk [vmem:[#allocation3 + $0x58] sm:$0xff] %vm610_vm1, %v931_v50  ;;  %v932_v12 = vsel %vm610_vm1, %v929_v51, %v931_v50  ;;  %vm1018_vm1 = vcmask 1043456   ;;  %v812_v50 = vld [vmem:[%s3481_s8 + $0xc0] sm:$0xff]  ;;  %v813_v51 = vld [vmem:[%s3481_s8 + $0xc8] sm:$0xff] }
 0x325   : > { %v1008_v63 = vpack.c.bf16 %v932_v12, %v2927_v60  ;;  %v2467_v12 = vpack.c.bf16 %v813_v51, %v812_v50  ;;  %1268 = vst.msk [vmem:[#allocation4 + $0x30] sm:$0xff] %vm1261_vm3, %v2656_v19  ;;  %1269 = vst.msk [vmem:[#allocation4 + $0x38] sm:$0xff] %vm1261_vm3, %v2656_v19 }
 0x326   : > { %1270 = vst.msk [vmem:[#allocation4 + $0x40] sm:$0xff] %vm1261_vm3, %v2656_v19  ;;  %1471 = vst.msk [vmem:[#allocation5] sm:$0xff] %vm1261_vm3, %v2656_v19 }
 0x327   : > { %v951_v52 = vpop.permute.xlu1 %950  ;;  %v949_v53 = vpop.permute.xlu0 %948  ;;  %v992_v55 = vld [vmem:[#allocation3 + $0x30] sm:$0xff]  ;;  %1472 = vst.msk [vmem:[#allocation5 + $0x8] sm:$0xff] %vm1261_vm3, %v2656_v19  ;;  %1473 = vst.msk [vmem:[#allocation5 + $0x10] sm:$0xff] %vm1261_vm3, %v2656_v19 }
 0x328   : > { %956 = vst.msk [vmem:[#allocation3 + $0x68] sm:$0xff] %vm590_vm4, %v951_v52  ;;  %v952_v14 = vsel %vm590_vm4, %v949_v53, %v951_v52  ;;  %v1006_v56 = vpack.c.bf16 %v992_v55, %v990_v54  ;;  %v796_v52 = vld [vmem:[%s3481_s8 + $0x40] sm:$0xff]  ;;  %v797_v53 = vld [vmem:[%s3481_s8 + $0x48] sm:$0xff]  ;;  %v814_v55 = vld [vmem:[%s3481_s8 + $0xd0] sm:$0xff]  ;;  %vm2665_vm4 = vmmov 0  }
 0x329   : > { %v1010_v4 = vpack.c.bf16 %v961_v35, %v952_v14  ;;  %v790_v35 = vld [vmem:[%s3481_s8 + $0x10] sm:$0xff]  ;;  %v2469_v54 = vpack.c.bf16 %v797_v53, %v796_v52  ;;  %v815_v14 = vld [vmem:[%s3481_s8 + $0xd8] sm:$0xff]  ;;  %1474 = vst.msk [vmem:[#allocation5 + $0x18] sm:$0xff] %vm1261_vm3, %v2656_v19  ;;  %1475 = vst.msk [vmem:[#allocation5 + $0x20] sm:$0xff] %vm1261_vm3, %v2656_v19 }
 0x32a   : > { %1028 = vmatpush1.bf16.msra.mxu0 %v1006_v56  ;;  %v2457_v37 = vpack.c.bf16 %v791_v36, %v790_v35  ;;  %v2471_v56 = vpack.c.bf16 %v815_v14, %v814_v55  ;;  %1476 = vst.msk [vmem:[#allocation5 + $0x28] sm:$0xff] %vm1261_vm3, %v2656_v19  ;;  %1477 = vst.msk [vmem:[#allocation5 + $0x30] sm:$0xff] %vm1261_vm3, %v2656_v19 }
 0x32b   : > { %v980_v58 = vpop.permute.xlu1 %979  ;;  %v997_v11 = vld [vmem:[#allocation3 + $0x58] sm:$0xff]  ;;  %v978_v59 = vpop.permute.xlu0 %977  ;;  %1478 = vst.msk [vmem:[#allocation5 + $0x38] sm:$0xff] %vm1261_vm3, %v2656_v19  ;;  %1479 = vst.msk [vmem:[#allocation5 + $0x40] sm:$0xff] %vm1261_vm3, %v2656_v19 }
 0x32c   : > { %985 = vst.msk [vmem:[#allocation3 + $0x88] sm:$0xff] %vm536_vm2, %v980_v58  ;;  %v1009_v61 = vpack.c.bf16 %v997_v11, %v2929_v13  ;;  %v981_v62 = vsel %vm536_vm2, %v978_v59, %v980_v58  ;;  %vm1014_vm2 = vcmask 588800   ;;  %2490 = vmatpush3.bf16.msra.mxu1 %v2457_v37  ;;  %v798_v58 = vld [vmem:[%s3481_s8 + $0x50] sm:$0xff]  ;;  %v799_v11 = vld [vmem:[%s3481_s8 + $0x58] sm:$0xff] }
 0x32d   : > { %v1012_v6 = vpack.c.bf16 %v981_v62, %v981_v62  ;;  %2492 = vmatprep.subr.bf16.mxu1 %v2459_v40  ;;  %v2473_v59 = vpack.c.bf16 %v799_v11, %v798_v58  ;;  %v817_v62 = vld [vmem:[%s3481_s8 + $0xe8] sm:$0xff]  ;;  %1480 = vst.msk [vmem:[#allocation5 + $0x48] sm:$0xff] %vm1261_vm3, %v2656_v19  ;;  %1481 = vst.msk [vmem:[#allocation5 + $0x50] sm:$0xff] %vm1261_vm3, %v2656_v19 }
 0x32e   : > { %1029 = vmatprep.subr.bf16.mxu0 %v1009_v61  ;;  %v816_v61 = vld [vmem:[%s3481_s8 + $0xe0] sm:$0xff]  ;;  %1482 = vst.msk [vmem:[#allocation5 + $0x58] sm:$0xff] %vm1261_vm3, %v2656_v19  ;;  %1483 = vst.msk [vmem:[#allocation5 + $0x60] sm:$0xff] %vm1261_vm3, %v2656_v19 }
 0x32f   : > { %1030 = vmatpush1.bf16.msra.mxu0 %v1008_v63  ;;  %v999_v0 = vld [vmem:[#allocation3 + $0x68] sm:$0xff]  ;;  %v1020_v9 = vsel %vm1018_vm1, %v1012_v6, 0  ;;  %v800_v63 = vld [vmem:[%s3481_s8 + $0x60] sm:$0xff]  ;;  %1484 = vst.msk [vmem:[#allocation5 + $0x68] sm:$0xff] %vm1261_vm3, %v2656_v19  ;;  %1485 = vst.msk [vmem:[#allocation5 + $0x70] sm:$0xff] %vm1261_vm3, %v2656_v19 }
 0x330   : > { %v1011_v2 = vpack.c.bf16 %v1001_v1, %v999_v0  ;;  %2494 = vmatpush3.bf16.msra.mxu1 %v2461_v43  ;;  %v2475_v0 = vpack.c.bf16 %v817_v62, %v816_v61  ;;  %v801_v1 = vld [vmem:[%s3481_s8 + $0x68] sm:$0xff]  ;;  %1486 = vst.msk [vmem:[#allocation5 + $0x78] sm:$0xff] %vm1261_vm3, %v2656_v19  ;;  %1487 = vst.msk [vmem:[#allocation5 + $0x80] sm:$0xff] %vm1261_vm3, %v2656_v19 }
 0x331   : > { %2496 = vmatprep.subr.bf16.mxu1 %v2463_v46  ;;  %v2477_v6 = vpack.c.bf16 %v801_v1, %v800_v63  ;;  %1488 = vst.msk [vmem:[#allocation5 + $0x88] sm:$0xff] %vm1261_vm3, %v2656_v19 }
 0x332   : > { %1031 = vmatprep.subr.bf16.mxu0 %v1011_v2  ;;  %v818_v2 = vld [vmem:[%s3481_s8 + $0xf0] sm:$0xff] }
 0x333   : > { %1032 = vmatpush1.bf16.msra.mxu0 %v1010_v4  ;;  %v1003_v7 = vld [vmem:[#allocation3 + $0x88] sm:$0xff] }
 0x334   : > { %v1013_v8 = vpack.c.bf16 %v1003_v7, %v1003_v7  ;;  %2498 = vmatpush3.bf16.msra.mxu1 %v2465_v49  ;;  %v819_v4 = vld [vmem:[%s3481_s8 + $0xf8] sm:$0xff] }
 0x335   : > { %2500 = vmatprep.subr.bf16.mxu1 %v2467_v12  ;;  %v2479_v7 = vpack.c.bf16 %v819_v4, %v818_v2 }
 0x336   : > { %2282 = vmatprep.subr.msk.bf16.mxu0 %vm1018_vm1, %v1013_v8  ;;  %v802_v8 = vld [vmem:[%s3481_s8 + $0x70] sm:$0xff] }
 0x337   : > { %1034 = vmatpush1.bf16.msra.mxu0 %v1020_v9  ;;  %v803_v9 = vld [vmem:[%s3481_s8 + $0x78] sm:$0xff] }
 0x338   : > { %2452 = vmatprep.subr.bf16.mxu0 %v2451_v28  ;;  %2502 = vmatpush3.bf16.msra.mxu1 %v2469_v54 }
 0x339   : > { %2504 = vmatprep.subr.bf16.mxu1 %v2471_v56 }
 0x33a   : > { %2283 = vmatmul.mubr.msk.bf16.vlgmr.msra.gmra.mrb[4].mxu0 %vm1014_vm2, %v785_v10  ;;  %v2481_v10 = vpack.c.bf16 %v803_v9, %v802_v8 }
 0x33b   : > { %2454 = vmatpush3.bf16.msra.mxu0 %v2453_v31 }
 0x33c   : > { %2456 = vmatprep.subr.bf16.mxu0 %v2455_v34  ;;  %2506 = vmatpush3.bf16.msra.mxu1 %v2473_v59 }
 0x33d   : > { %2508 = vmatprep.subr.bf16.mxu1 %v2475_v0 }
 0x33f   : > { %2458 = vmatpush3.bf16.msra.mxu0 %v2457_v37 }
 0x340   : > { %2460 = vmatprep.subr.bf16.mxu0 %v2459_v40  ;;  %2510 = vmatpush3.bf16.msra.mxu1 %v2477_v6 }
 0x341   : > { %2512 = vmatprep.subr.bf16.mxu1 %v2479_v7 }
 0x343   : > { %2462 = vmatpush3.bf16.msra.mxu0 %v2461_v43 }
 0x344   : > { %2464 = vmatprep.subr.bf16.mxu0 %v2463_v46  ;;  %2514 = vmatpush3.bf16.msra.mxu1 %v2481_v10 }
 0x345   : > { %1620 = vmatprep.subr.bf16.mxu1 %v2658_v57 }
 0x347   : > { %2466 = vmatpush3.bf16.msra.mxu0 %v2465_v49 }
 0x348   : > { %2468 = vmatprep.subr.bf16.mxu0 %v2467_v12 }
 0x34b   : > { %2470 = vmatpush3.bf16.msra.mxu0 %v2469_v54 }
 0x34c   : > { %2472 = vmatprep.subr.bf16.mxu0 %v2471_v56 }
 0x34f   : > { %2474 = vmatpush3.bf16.msra.mxu0 %v2473_v59 }
 0x350   : > { %2476 = vmatprep.subr.bf16.mxu0 %v2475_v0 }
 0x353   : > { %2478 = vmatpush3.bf16.msra.mxu0 %v2477_v6 }
 0x354   : > { %2480 = vmatprep.subr.bf16.mxu0 %v2479_v7 }
 0x357   : > { %2482 = vmatpush3.bf16.msra.mxu0 %v2481_v10 }
 0x358   : > { %2399 = vmatprep.subr.bf16.mxu0 %v2656_v19 }
 0x40d   : > { %v2989_v15 = vpop.f32.mrb[4].mxu0 }
 0x40e   : > { %v2991_v16 = vpop.f32.mrb[5].mxu0  ;;  %v1070_v17 = vmul.f32 %v2989_v15, %v2989_v15 }
 0x40f   : > { %v1063_v18 = vpop.f32.mrb[6].mxu0  ;;  %v1066_v20 = vadd.f32 %v2991_v16, %v2989_v15  ;;  %v1071_v21 = vmul.f32 %v2991_v16, %v2991_v16 }
 0x410   : > { %v1064_v22 = vpop.f32.mrb[7].mxu0 }
 0x411   : > { %1067 = vadd.xlane.f32.xlu0 %v1066_v20  ;;  %v1072_v23 = vadd.f32 %v1071_v21, %v1070_v17  ;;  %v497_v17 = vld [vmem:[%s3475_s2] sm:$0x3] }
 0x412   : > { %v1274_v18 = vrot.slane %v497_v17, %v2763_v3  ;;  %v1295_v20 = vrot.slane %v497_v17, %v2765_v5 }
 0x413   : > { %1073 = vadd.xlane.f32.xlu1 %v1072_v23 }
 0x424   : > { %1094 = vperm.xlu1 %2579, %v787_v24  }
 0x427   : > { %1087 = vperm.xlu0 %2578, %v786_v25  }
 0x428   : > { %1276 = vrot.lane.b32.xlu1 %v1274_v18, %s2659_s16 }
 0x42c   : > { %1297 = vrot.lane.b32.xlu1 %v1295_v20, %s2660_s17 }
 0x430   : > { %1307 = vrot.lane.b32.xlu1 %v1274_v18, %s2649_s23 }
 0x434   : > { %1318 = vrot.lane.b32.xlu1 %v1295_v20, %s2651_s28 }
 0x438   : > { %1328 = vrot.lane.b32.xlu1 %v1274_v18, %s2661_s20 }
 0x43c   : > { %1343 = vrot.lane.b32.xlu1 %v1295_v20, %s2662_s21 }
 0x49e   : > { %v1068_v21 = vpop.xlane.xlu0 %1067 }
 0x49f   : > { %v1069_v22 = vmul.f32 0.00390625, %v1068_v21 }
 0x4a0   : > { %v1074_v23 = vpop.xlane.xlu1 %1073 }
 0x4a1   : > { %v1075_v24 = vmul.f32 0.00390625, %v1074_v23  ;;  %v1076_v25 = vmul.f32 %v1069_v22, %v1069_v22  ;;  %v1079_v29 = vsub.f32 %v2989_v15, %v1069_v22  ;;  %v1080_v30 = vsub.f32 %v2991_v16, %v1069_v22 }
 0x4a3   : > { %v1077_v26 = vsub.f32 %v1075_v24, %v1076_v25 }
 0x4a4   : > { %v1095_v35 = vpop.permute.xlu1 %1094 }
 0x4a5   : > { %v1078_v27 = vmax.f32 %v1077_v26, 0.0 }
 0x4a6   : > { %v1088_v32 = vpop.permute.xlu0 %1087 }
 0x4a7   : > { %v1081_v28 = vadd.f32 1e-05, %v1078_v27 }
 0x4a9   : > { %2593 = vrsqrt.f32 %v1081_v28 }
 0x4b3   : > { %v2594_v31 = vpop.eup %2593 }
 0x4b4   : > { %v1083_v33 = vmul.f32 %v2594_v31, %v1079_v29  ;;  %v1084_v34 = vmul.f32 %v2594_v31, %v1080_v30 }
 0x4b6   : > { %v1090_v36 = vmul.f32 %v1088_v32, %v1083_v33  ;;  %v1091_v37 = vmul.f32 %v1088_v32, %v1084_v34 }
 0x4b8   : > { %v1097_v38 = vadd.f32 %v1095_v35, %v1090_v36  ;;  %v1098_v39 = vadd.f32 %v1095_v35, %v1091_v37 }
 0x4ba   : > { %v1099_v40 = vsub.f32 0.0, %v1097_v38  ;;  %v1100_v41 = vsub.f32 0.0, %v1098_v39 }
 0x4bc   : > { %v1101_v42 = vmul.f32 1.442695, %v1099_v40  ;;  %v1103_v43 = vmul.f32 1.442695, %v1100_v41  ;;  %v2581_v41 = vld [vmem:[%s3482_s9] sm:$0xff]  }
 0x4be   : > { %2595 = vpow2.f32 %v1101_v42 }
 0x4bf   : > { %2597 = vpow2.f32 %v1103_v43 }
 0x4c8   : > { %v2596_v44 = vpop.eup %2595 }
 0x4c9   : > { %v2598_v45 = vpop.eup %2597  ;;  %v1105_v15 = vadd.f32 1.0, %v2596_v44 }
 0x4ca   : > { %v1106_v46 = vadd.f32 1.0, %v2598_v45 }
 0x4cb   : > { %2599 = vrcp.f32 %v1105_v15 }
 0x4cc   : > { %2601 = vrcp.f32 %v1106_v46 }
 0x4d5   : > { %v2600_v16 = vpop.eup %2599 }
 0x4d6   : > { %v2602_v47 = vpop.eup %2601  ;;  %v1111_v48 = vmul.f32 12.0, %v2600_v16 }
 0x4d7   : > { %v1112_v49 = vmul.f32 12.0, %v2602_v47 }
 0x4d8   : > { %v1113_v50 = vmul.f32 1.442695, %v1111_v48 }
 0x4d9   : > { %v1115_v51 = vmul.f32 1.442695, %v1112_v49 }
 0x4da   : > { %2603 = vpow2.f32 %v1113_v50 }
 0x4db   : > { %2605 = vpow2.f32 %v1115_v51 }
 0x4e4   : > { %v2604_v12 = vpop.eup %2603 }
 0x4e5   : > { %v2606_v52 = vpop.eup %2605  ;;  %v1117_v53 = vmul.f32 %v2604_v12, %v2927_v60  ;;  %v3172_v60 = vpop.permute.xlu1 %1276 }
 0x4e6   : > { %1253 = vmatprep.mubr.f32.mxu1 %v2606_v52  ;;  %v1118_v54 = vmul.f32 %v2606_v52, %v2929_v13 }
 0x4e7   : > { %1254 = vmatmul.mubr.f32.vlgmr.msra.gmra.mrb[0].mxu1 %v2604_v12 }
 0x4e8   : > { %1183 = vmatprep.mubr.f32.mxu0 %v1118_v54 }
 0x4e9   : > { %1184 = vmatmul.mubr.f32.vlgmr.msra.gmra.mrb[8].mxu0 %v1117_v53  ;;  %v3174_v13 = vpop.permute.xlu1 %1297 }
 0x4ea   : > { %2409 = vmatprep.mubr.msk.bf16.mxu0 %vm2665_vm4, %v2656_v19  ;;  %vm2029_vm4 = vcmask 97280  }
 0x4ed   : > { %v3176_v61 = vpop.permute.xlu1 %1307 }
 0x4f1   : > { %v3178_v62 = vpop.permute.xlu1 %1318 }
 0x4f5   : > { %v3182_v1 = vpop.permute.xlu1 %1328 }
 0x4f9   : > { %v3190_v8 = vpop.permute.xlu1 %1343 }
 0x5ba   : > { %v2370_v55 = vpop.f32.mrb[0].mxu1 }
 0x5bb   : > { %v2371_v14 = vpop.f32.mrb[1].mxu1 }
 0x5bc   : > { %v2372_v56 = vadd.f32 %v2371_v14, %v2370_v55  ;;  %v2335_v58 = vpop.f32.mrb[8].mxu0 }
 0x5bd   : > { %v2336_v11 = vpop.f32.mrb[9].mxu0 }
 0x5be   : > { %2607 = vrcp.f32 %v2372_v56  ;;  %v2337_v59 = vadd.f32 %v2336_v11, %v2335_v58 }
 0x5c8   : > { %v2608_v63 = vpop.eup %2607 }
 0x5c9   : > { %v1260_v0 = vmul.f32 %v2608_v63, %v2337_v59 }
 0x5cb   : > { %1287 = vrot.lane.b32.xlu1 %v1260_v0, %s2663_s22  ;;  %1317 = vst.msk [vmem:[#allocation4 + $0x20] sm:$0xff] %vm1261_vm3, %v1260_v0  ;;  %v1279_v2 = vmul.f32 %v3172_v60, %v1260_v0  ;;  %v1310_v4 = vmul.f32 %v3176_v61, %v1260_v0  ;;  %v1300_v6 = vmul.f32 %v3174_v13, %v1260_v0 }
 0x5cc   : > { %v1331_v7 = vmul.f32 %v3182_v1, %v1260_v0  ;;  %v1321_v9 = vmul.f32 %v3178_v62, %v1260_v0  ;;  %v1346_v10 = vmul.f32 %v3190_v8, %v1260_v0 }
 0x5cd   : > { %1281 = vrot.lane.b32.xlu0 %v1279_v2, %s2662_s21 }
 0x5cf   : > { %1312 = vrot.lane.b32.xlu1 %v1310_v4, %s2651_s28 }
 0x5d1   : > { %1302 = vrot.lane.b32.xlu0 %v1300_v6, %s2661_s20 }
 0x5d2   : > { %v1357_v32 = vld [vmem:[#allocation4 + $0x20] sm:$0xff] }
 0x5d3   : > { %1333 = vrot.lane.b32.xlu1 %v1331_v7, %s2660_s17 }
 0x5d5   : > { %1323 = vrot.lane.b32.xlu0 %v1321_v9, %s2649_s23 }
 0x5d7   : > { %1348 = vrot.lane.b32.xlu1 %v1346_v10, %s2659_s16 }
 0x5d9   : > { %1338 = vrot.lane.b32.xlu0 %v1260_v0, %s2664_s24 }
 0x63d   : > { %v1288_v17 = vpop.permute.xlu1 %1287 }
 0x63e   : > { %1291 = vst.msk [vmem:[#allocation4 + $0x8] sm:$0xff] %vm1290_vm7, %v1288_v17 }
 0x63f   : > { %v1282_v18 = vpop.permute.xlu0 %1281 }
 0x640   : > { %1285 = vst.msk [vmem:[#allocation4] sm:$0xff] %vm1284_vm9, %v1282_v18 }
 0x641   : > { %v1313_v20 = vpop.permute.xlu1 %1312 }
 0x642   : > { %1316 = vst.msk [vmem:[#allocation4 + $0x18] sm:$0xff] %vm1315_vm14, %v1313_v20 }
 0x643   : > { %v1303_v21 = vpop.permute.xlu0 %1302 }
 0x644   : > { %1306 = vst.msk [vmem:[#allocation4 + $0x10] sm:$0xff] %vm1305_vm15, %v1303_v21 }
 0x645   : > { %v1334_v22 = vpop.permute.xlu1 %1333  ;;  %v1354_v25 = vld [vmem:[#allocation4 + $0x8] sm:$0xff] }
 0x646   : > { %1337 = vst.msk [vmem:[#allocation4 + $0x30] sm:$0xff] %vm1336_vm6, %v1334_v22 }
 0x647   : > { %v1324_v23 = vpop.permute.xlu0 %1323  ;;  %v1353_v24 = vld [vmem:[#allocation4] sm:$0xff] }
 0x648   : > { %1327 = vst.msk [vmem:[#allocation4 + $0x28] sm:$0xff] %vm1326_vm8, %v1324_v23  ;;  %v1362_v27 = vpack.c.bf16 %v1354_v25, %v1353_v24 }
 0x649   : > { %v1349_v26 = vpop.permute.xlu1 %1348  ;;  %v1356_v30 = vld [vmem:[#allocation4 + $0x18] sm:$0xff] }
 0x64a   : > { %1352 = vst.msk [vmem:[#allocation4 + $0x40] sm:$0xff] %vm1351_vm10, %v1349_v26  ;;  %2400 = vmatpush3.bf16.msra.mxu0 %v1362_v27 }
 0x64b   : > { %v1339_v28 = vpop.permute.xlu0 %1338  ;;  %2401 = vmatprep.subr.bf16.mxu0 %v2656_v19  ;;  %v1355_v29 = vld [vmem:[#allocation4 + $0x10] sm:$0xff] }
 0x64c   : > { %1342 = vst.msk [vmem:[#allocation4 + $0x38] sm:$0xff] %vm1341_vm11, %v1339_v28  ;;  %v1363_v31 = vpack.c.bf16 %v1356_v30, %v1355_v29  ;;  %v2582_v29 = vld [vmem:[%s3483_s10 + $0x4] ss:$8 sps:$4 sm:$0xff]  }
 0x64d   : > { %v1359_v36 = vld [vmem:[#allocation4 + $0x30] sm:$0xff]  ;;  %2288 = vmatprep.mubr.msk.bf16.mxu1 %vm559_vm0, %v2582_v29  ;;  %v1460_v29 = vld [vmem:[%s3486_s13 + $0x8] sm:$0xff] }
 0x64e   : > { %2402 = vmatpush3.bf16.msra.mxu0 %v1363_v31 }
 0x64f   : > { %2403 = vmatprep.subr.bf16.mxu0 %v2656_v19  ;;  %v1358_v33 = vld [vmem:[#allocation4 + $0x28] sm:$0xff] }
 0x650   : > { %v1364_v34 = vpack.c.bf16 %v1358_v33, %v1357_v32 }
 0x651   : > { %v1361_v35 = vld [vmem:[#allocation4 + $0x40] sm:$0xff] }
 0x652   : > { %2404 = vmatpush3.bf16.msra.mxu0 %v1364_v34  ;;  %v1366_v39 = vpack.c.bf16 %v1361_v35, %v1361_v35 }
 0x653   : > { %2405 = vmatprep.subr.bf16.mxu0 %v2656_v19  ;;  %v1360_v37 = vld [vmem:[#allocation4 + $0x38] sm:$0xff] }
 0x654   : > { %v1365_v38 = vpack.c.bf16 %v1360_v37, %v1359_v36  ;;  %v1376_v40 = vsel %vm1018_vm1, %v1366_v39, 0  ;;  %vm1971_vm1 = vcmask 130072  }
 0x656   : > { %2406 = vmatpush3.bf16.msra.mxu0 %v1365_v38 }
 0x657   : > { %2407 = vmatprep.subr.bf16.mxu0 %v2656_v19 }
 0x65a   : > { %2408 = vmatpush3.bf16.msra.mxu0 %v1376_v40 }
 0x65d   : > { %2410 = vmatmul.mubr.msk.bf16.vlgmr.msra.gmra.mrb[12].mxu0 %vm1014_vm2, %v2581_v41  ;;  %vm1987_vm2 = vcmask 130056  }
 0x730   : > { %v1412_v42 = vpop.f32.mrb[12].mxu0 }
 0x731   : > { %v2411_v43 = vpop.f32.mrb[13].mxu0  ;;  %v1419_v44 = vsel %vm1261_vm3, %v1412_v42, 0.0  ;;  %v1427_v45 = vmul.f32 %v1412_v42, %v1412_v42 }
 0x732   : > { %1420 = vadd.xlane.f32.xlu0 %v1419_v44  ;;  %v1415_v15 = vpop.f32.mrb[14].mxu0 }
 0x733   : > { %v2412_v46 = vpop.f32.mrb[15].mxu0  ;;  %v1422_v16 = vsel %vm1261_vm3, %v1415_v15, 0.0  ;;  %v1429_v19 = vsel %vm1261_vm3, %v1427_v45, 0.0  ;;  %v1428_v47 = vmul.f32 %v1415_v15, %v1415_v15 }
 0x734   : > { %1423 = vadd.xlane.f32.xlu1 %v1422_v16 }
 0x735   : > { %v1432_v48 = vsel %vm1261_vm3, %v1428_v47, 0.0 }
 0x736   : > { %1430 = vadd.xlane.f32.xlu0 %v1429_v19 }
 0x73a   : > { %1433 = vadd.xlane.f32.xlu0 %v1432_v48 }
 0x7bf   : > { %v1421_v49 = vpop.xlane.xlu0 %1420 }
 0x7c0   : > { %v1425_v50 = vmul.f32 0.015625, %v1421_v49 }
 0x7c1   : > { %v1424_v51 = vpop.xlane.xlu1 %1423 }
 0x7c2   : > { %v1437_v52 = vmul.f32 %v1425_v50, %v1425_v50  ;;  %v1426_v53 = vmul.f32 0.015625, %v1424_v51  ;;  %v1443_v4 = vsub.f32 %v1412_v42, %v1425_v50 }
 0x7c3   : > { %v1431_v12 = vpop.xlane.xlu0 %1430 }
 0x7c4   : > { %v1435_v54 = vmul.f32 0.015625, %v1431_v12  ;;  %v1438_v56 = vmul.f32 %v1426_v53, %v1426_v53  ;;  %v1444_v9 = vsub.f32 %v1415_v15, %v1426_v53 }
 0x7c6   : > { %v1439_v55 = vsub.f32 %v1435_v54, %v1437_v52 }
 0x7c7   : > { %v1434_v14 = vpop.xlane.xlu0 %1433 }
 0x7c8   : > { %v1441_v58 = vmax.f32 %v1439_v55, 0.0  ;;  %v1436_v11 = vmul.f32 0.015625, %v1434_v14 }
 0x7ca   : > { %v1445_v59 = vadd.f32 1e-05, %v1441_v58  ;;  %v1440_v63 = vsub.f32 %v1436_v11, %v1438_v56 }
 0x7cc   : > { %2609 = vrsqrt.f32 %v1445_v59  ;;  %v1442_v0 = vmax.f32 %v1440_v63, 0.0 }
 0x7ce   : > { %v1446_v2 = vadd.f32 1e-05, %v1442_v0 }
 0x7d0   : > { %2611 = vrsqrt.f32 %v1446_v2 }
 0x7d6   : > { %v2610_v6 = vpop.eup %2609 }
 0x7d7   : > { %v1449_v7 = vmul.f32 %v2610_v6, %v1443_v4 }
 0x7d9   : > { %v3221_v10 = vmax.f32 %v1449_v7, 0.0 }
 0x7da   : > { %v2612_v17 = vpop.eup %2611 }
 0x7db   : > { %1535 = vst.msk [vmem:[#allocation5 + $0x40] sm:$0xff] %vm1261_vm3, %v3221_v10  ;;  %v1450_v18 = vmul.f32 %v2612_v17, %v1444_v9  ;;  %v1489_v20 = vmul.f32 %v3221_v10, %v3172_v60  ;;  %v1511_v23 = vmul.f32 %v3221_v10, %v3174_v13  ;;  %v1523_v25 = vmul.f32 %v3221_v10, %v3176_v61  ;;  %v2584_v17 = vld [vmem:[%s3483_s10] ss:$8 sps:$4 sm:$0xff]  }
 0x7dc   : > { %v1537_v26 = vmul.f32 %v3221_v10, %v3178_v62  ;;  %v1549_v27 = vmul.f32 %v3221_v10, %v3182_v1  ;;  %v1569_v28 = vmul.f32 %v3221_v10, %v3190_v8 }
 0x7dd   : > { %v3227_v21 = vmax.f32 %v1450_v18, 0.0  ;;  %1493 = vrot.lane.b32.xlu1 %v1489_v20, %s2662_s21 }
 0x7df   : > { %1536 = vst.msk [vmem:[#allocation5 + $0x48] sm:$0xff] %vm1261_vm3, %v3227_v21  ;;  %v1490_v22 = vmul.f32 %v3227_v21, %v3172_v60  ;;  %v1512_v24 = vmul.f32 %v3227_v21, %v3174_v13  ;;  %v1524_v60 = vmul.f32 %v3227_v21, %v3176_v61  ;;  %v1538_v13 = vmul.f32 %v3227_v21, %v3178_v62 }
 0x7e0   : > { %v1550_v61 = vmul.f32 %v3227_v21, %v3182_v1  ;;  %v1570_v62 = vmul.f32 %v3227_v21, %v3190_v8  ;;  %v1455_v1 = vld [vmem:[%s3484_s11] sm:$0xff] }
 0x7e1   : > { %1503 = vrot.lane.b32.xlu1 %v3221_v10, %s2663_s22  ;;  %1495 = vrot.lane.b32.xlu0 %v1490_v22, %s2662_s21 }
 0x7e2   : > { %v1589_v53 = vld [vmem:[#allocation5 + $0x40] sm:$0xff] }
 0x7e5   : > { %1505 = vrot.lane.b32.xlu1 %v3227_v21, %s2663_s22  ;;  %1515 = vrot.lane.b32.xlu0 %v1511_v23, %s2661_s20 }
 0x7e6   : > { %v1590_v51 = vld [vmem:[#allocation5 + $0x48] sm:$0xff] }
 0x7e7   : > { %v1603_v54 = vpack.c.bf16 %v1590_v51, %v1589_v53 }
 0x7e9   : > { %1517 = vrot.lane.b32.xlu1 %v1512_v24, %s2661_s20  ;;  %1527 = vrot.lane.b32.xlu0 %v1523_v25, %s2651_s28 }
 0x7ed   : > { %1529 = vrot.lane.b32.xlu1 %v1524_v60, %s2651_s28  ;;  %1541 = vrot.lane.b32.xlu0 %v1537_v26, %s2649_s23 }
 0x7f1   : > { %1543 = vrot.lane.b32.xlu1 %v1538_v13, %s2649_s23  ;;  %1553 = vrot.lane.b32.xlu0 %v1549_v27, %s2660_s17 }
 0x7f5   : > { %1555 = vrot.lane.b32.xlu1 %v1550_v61, %s2660_s17  ;;  %1561 = vrot.lane.b32.xlu0 %v3221_v10, %s2664_s24  ;;  %v1457_v61 = vld [vmem:[%s3485_s12] sm:$0xff] }
 0x7f9   : > { %1563 = vrot.lane.b32.xlu1 %v3227_v21, %s2664_s24  ;;  %1573 = vrot.lane.b32.xlu0 %v1569_v28, %s2659_s16  ;;  %v1458_v28 = vld [vmem:[%s3485_s12 + $0x8] sm:$0xff]  ;;  %s2666_s24 = smov 123  }
 0x7fd   : > { %1575 = vrot.lane.b32.xlu1 %v1570_v62, %s2659_s16  ;;  %v1456_v62 = vld [vmem:[%s3484_s11 + $0x8] sm:$0xff] }
 0x801   : > { %1695 = vperm.xlu1 %2579, %v1455_v1   ;;  %v1459_v1 = vld [vmem:[%s3486_s13] sm:$0xff] }
 0x84f   : > { %v1494_v30 = vpop.permute.xlu1 %1493 }
 0x850   : > { %1499 = vst.msk [vmem:[#allocation5] sm:$0xff] %vm1284_vm9, %v1494_v30  ;;  %v3337_v30 = vpack.c.bf16 %v1460_v29, %v1459_v1 }
 0x852   : > { %2516 = vmatprep.subr.bf16.mxu0 %v3337_v30 }
 0x853   : > { %v1496_v31 = vpop.permute.xlu0 %1495  ;;  %v1504_v32 = vpop.permute.xlu1 %1503  ;;  %2518 = vmatpush3.bf16.msra.mxu0 %v3337_v30 }
 0x854   : > { %1500 = vst.msk [vmem:[#allocation5 + $0x8] sm:$0xff] %vm1284_vm9, %v1496_v31  ;;  %v1461_v31 = vld [vmem:[%s3486_s13 + $0x10] sm:$0xff] }
 0x855   : > { %1509 = vst.msk [vmem:[#allocation5 + $0x10] sm:$0xff] %vm1290_vm7, %v1504_v32  ;;  %v1462_v32 = vld [vmem:[%s3486_s13 + $0x18] sm:$0xff] }
 0x857   : > { %v1516_v8 = vpop.permute.xlu0 %1515  ;;  %v1506_v33 = vpop.permute.xlu1 %1505  ;;  %v1581_v36 = vld [vmem:[#allocation5] sm:$0xff] }
 0x858   : > { %1521 = vst.msk [vmem:[#allocation5 + $0x20] sm:$0xff] %vm1305_vm15, %v1516_v8  ;;  %v3347_v8 = vpack.c.bf16 %v1462_v32, %v1461_v31 }
 0x859   : > { %1510 = vst.msk [vmem:[#allocation5 + $0x18] sm:$0xff] %vm1290_vm7, %v1506_v33  ;;  %v1463_v33 = vld [vmem:[%s3486_s13 + $0x20] sm:$0xff] }
 0x85a   : > { %2520 = vmatprep.subr.bf16.mxu0 %v3347_v8 }
 0x85b   : > { %v1528_v34 = vpop.permute.xlu0 %1527  ;;  %v1518_v35 = vpop.permute.xlu1 %1517  ;;  %v1582_v37 = vld [vmem:[#allocation5 + $0x8] sm:$0xff]  ;;  %2522 = vmatpush3.bf16.msra.mxu0 %v3347_v8 }
 0x85c   : > { %1533 = vst.msk [vmem:[#allocation5 + $0x30] sm:$0xff] %vm1315_vm14, %v1528_v34  ;;  %v1599_v38 = vpack.c.bf16 %v1582_v37, %v1581_v36  ;;  %v1583_v41 = vld [vmem:[#allocation5 + $0x10] sm:$0xff]  ;;  %v1464_v34 = vld [vmem:[%s3486_s13 + $0x28] sm:$0xff] }
 0x85d   : > { %1522 = vst.msk [vmem:[#allocation5 + $0x28] sm:$0xff] %vm1305_vm15, %v1518_v35  ;;  %v1465_v35 = vld [vmem:[%s3486_s13 + $0x30] sm:$0xff]  ;;  %v3359_v36 = vpack.c.bf16 %v1464_v34, %v1463_v33  ;;  %v1466_v37 = vld [vmem:[%s3486_s13 + $0x38] sm:$0xff] }
 0x85e   : > { %1621 = vmatpush1.bf16.msra.mxu1 %v1599_v38  ;;  %v3366_v38 = vpack.c.bf16 %v1466_v37, %v1465_v35 }
 0x85f   : > { %v1542_v39 = vpop.permute.xlu0 %1541  ;;  %v1530_v40 = vpop.permute.xlu1 %1529  ;;  %1622 = vmatprep.subr.bf16.mxu1 %v2658_v57  ;;  %v1585_v15 = vld [vmem:[#allocation5 + $0x20] sm:$0xff]  ;;  %2524 = vmatprep.subr.bf16.mxu0 %v3359_v36 }
 0x860   : > { %v1584_v42 = vld [vmem:[#allocation5 + $0x18] sm:$0xff]  ;;  %1547 = vst.msk [vmem:[#allocation5 + $0x50] sm:$0xff] %vm1326_vm8, %v1542_v39  ;;  %2526 = vmatpush3.bf16.msra.mxu0 %v3359_v36 }
 0x861   : > { %1534 = vst.msk [vmem:[#allocation5 + $0x38] sm:$0xff] %vm1315_vm14, %v1530_v40  ;;  %v1600_v43 = vpack.c.bf16 %v1584_v42, %v1583_v41  ;;  %2528 = vmatprep.subr.bf16.mxu0 %v3366_v38  ;;  %v498_v39 = vld [vmem:[%s3476_s3] sm:$0x3] }
 0x862   : > { %v1924_v40 = vrot.slane %v498_v39, %v2763_v3  ;;  %v1956_v41 = vrot.slane %v498_v39, %v2765_v5 }
 0x863   : > { %1623 = vmatpush1.bf16.msra.mxu1 %v1600_v43  ;;  %v1554_v44 = vpop.permute.xlu0 %1553  ;;  %v1544_v45 = vpop.permute.xlu1 %1543  ;;  %v1587_v48 = vld [vmem:[#allocation5 + $0x30] sm:$0xff] }
 0x864   : > { %1624 = vmatprep.subr.bf16.mxu1 %v2658_v57  ;;  %v1586_v46 = vld [vmem:[#allocation5 + $0x28] sm:$0xff]  ;;  %1559 = vst.msk [vmem:[#allocation5 + $0x60] sm:$0xff] %vm1336_vm6, %v1554_v44  ;;  %2530 = vmatpush3.bf16.msra.mxu0 %v3366_v38 }
 0x865   : > { %1548 = vst.msk [vmem:[#allocation5 + $0x58] sm:$0xff] %vm1326_vm8, %v1544_v45  ;;  %v1601_v16 = vpack.c.bf16 %v1586_v46, %v1585_v15  ;;  %2532 = vmatprep.subr.bf16.mxu0 %v3337_v30 }
 0x867   : > { %1625 = vmatpush1.bf16.msra.mxu1 %v1601_v16  ;;  %v1562_v19 = vpop.permute.xlu0 %1561  ;;  %v1556_v47 = vpop.permute.xlu1 %1555  ;;  %v1591_v56 = vld [vmem:[#allocation5 + $0x50] sm:$0xff] }
 0x868   : > { %1626 = vmatprep.subr.bf16.mxu1 %v2658_v57  ;;  %v1588_v49 = vld [vmem:[#allocation5 + $0x38] sm:$0xff]  ;;  %1567 = vst.msk [vmem:[#allocation5 + $0x70] sm:$0xff] %vm1341_vm11, %v1562_v19 }
 0x869   : > { %1560 = vst.msk [vmem:[#allocation5 + $0x68] sm:$0xff] %vm1336_vm6, %v1556_v47  ;;  %v1602_v50 = vpack.c.bf16 %v1588_v49, %v1587_v48 }
 0x86b   : > { %1627 = vmatpush1.bf16.msra.mxu1 %v1602_v50  ;;  %v1574_v12 = vpop.permute.xlu0 %1573  ;;  %v1564_v52 = vpop.permute.xlu1 %1563  ;;  %v1593_v59 = vld [vmem:[#allocation5 + $0x60] sm:$0xff] }
 0x86c   : > { %1628 = vmatprep.subr.bf16.mxu1 %v2658_v57  ;;  %1579 = vst.msk [vmem:[#allocation5 + $0x80] sm:$0xff] %vm1351_vm10, %v1574_v12  ;;  %v1592_v55 = vld [vmem:[#allocation5 + $0x58] sm:$0xff] }
 0x86d   : > { %1568 = vst.msk [vmem:[#allocation5 + $0x78] sm:$0xff] %vm1341_vm11, %v1564_v52  ;;  %v1604_v58 = vpack.c.bf16 %v1592_v55, %v1591_v56 }
 0x86f   : > { %1629 = vmatpush1.bf16.msra.mxu1 %v1603_v54  ;;  %v1576_v14 = vpop.permute.xlu1 %1575  ;;  %v1595_v2 = vld [vmem:[#allocation5 + $0x70] sm:$0xff] }
 0x870   : > { %1630 = vmatprep.subr.bf16.mxu1 %v2658_v57  ;;  %1580 = vst.msk [vmem:[#allocation5 + $0x88] sm:$0xff] %vm1351_vm10, %v1576_v14  ;;  %v1594_v11 = vld [vmem:[#allocation5 + $0x68] sm:$0xff] }
 0x871   : > { %v1605_v63 = vpack.c.bf16 %v1594_v11, %v1593_v59 }
 0x873   : > { %1631 = vmatpush1.bf16.msra.mxu1 %v1604_v58  ;;  %v1597_v7 = vld [vmem:[#allocation5 + $0x80] sm:$0xff] }
 0x874   : > { %1632 = vmatprep.subr.bf16.mxu1 %v2658_v57  ;;  %v1596_v0 = vld [vmem:[#allocation5 + $0x78] sm:$0xff] }
 0x875   : > { %v1606_v4 = vpack.c.bf16 %v1596_v0, %v1595_v2 }
 0x877   : > { %1633 = vmatpush1.bf16.msra.mxu1 %v1605_v63  ;;  %v1598_v6 = vld [vmem:[#allocation5 + $0x88] sm:$0xff] }
 0x878   : > { %1634 = vmatprep.subr.bf16.mxu1 %v2658_v57  ;;  %v1607_v9 = vpack.c.bf16 %v1598_v6, %v1597_v7 }
 0x87b   : > { %1635 = vmatpush1.bf16.msra.mxu1 %v1606_v4 }
 0x87c   : > { %1636 = vmatprep.subr.bf16.mxu1 %v2658_v57 }
 0x87f   : > { %1637 = vmatpush1.bf16.msra.mxu1 %v1607_v9 }
 0x880   : > { %2099 = vmatprep.subr.bf16.mxu1 %v2658_v57  ;;  %v1696_v42 = vpop.permute.xlu1 %1695 }
 0x882   : > { %1653 = vmatmul.mubr.bf16.vlgmr.msra.gmra.mrb[4].mxu1 %v2584_v17 }
 0x955   : > { %v3308_v18 = vpop.f32.mrb[4].mxu1 }
 0x956   : > { %v1656_v20 = vpop.f32.mrb[5].mxu1  ;;  %v1661_v22 = vsel %vm1261_vm3, %v3308_v18, 0.0  ;;  %v1669_v23 = vmul.f32 %v3308_v18, %v3308_v18 }
 0x957   : > { %1662 = vadd.xlane.f32.xlu0 %v1661_v22  ;;  %v3314_v24 = vpop.f32.mrb[6].mxu1 }
 0x958   : > { %v1659_v25 = vpop.f32.mrb[7].mxu1  ;;  %v1664_v60 = vsel %vm1261_vm3, %v3314_v24, 0.0  ;;  %v1671_v26 = vsel %vm1261_vm3, %v1669_v23, 0.0  ;;  %v1670_v13 = vmul.f32 %v3314_v24, %v3314_v24 }
 0x959   : > { %1665 = vadd.xlane.f32.xlu1 %v1664_v60 }
 0x95a   : > { %v1674_v27 = vsel %vm1261_vm3, %v1670_v13, 0.0 }
 0x95b   : > { %1672 = vadd.xlane.f32.xlu0 %v1671_v26 }
 0x95f   : > { %1675 = vadd.xlane.f32.xlu0 %v1674_v27 }
 0x96a   : > { %1707 = vperm.xlu1 %2579, %v1457_v61  }
 0x96e   : > { %1712 = vperm.xlu1 %2579, %v1458_v28  }
 0x972   : > { %1958 = vrot.lane.b32.xlu1 %v1956_v41, %s2667_s25 }
 0x975   : > { %1700 = vperm.xlu0 %2578, %v1456_v62  }
 0x976   : > { %1992 = vrot.lane.b32.xlu1 %v1956_v41, %s2651_s28 }
 0x979   : > { %1926 = vrot.lane.b32.xlu0 %v1924_v40, %s2666_s24 }
 0x97a   : > { %2032 = vrot.lane.b32.xlu1 %v1956_v41, %s2669_s27 }
 0x97d   : > { %1974 = vrot.lane.b32.xlu0 %v1924_v40, %s2649_s23 }
 0x981   : > { %2007 = vrot.lane.b32.xlu0 %v1924_v40, %s2668_s26 }
 0x9e4   : > { %v1663_v3 = vpop.xlane.xlu0 %1662 }
 0x9e5   : > { %v1667_v43 = vmul.f32 0.015625, %v1663_v3 }
 0x9e6   : > { %v1666_v5 = vpop.xlane.xlu1 %1665 }
 0x9e7   : > { %v1679_v45 = vmul.f32 %v1667_v43, %v1667_v43  ;;  %v1668_v15 = vmul.f32 0.015625, %v1666_v5  ;;  %v1685_v53 = vsub.f32 %v3308_v18, %v1667_v43 }
 0x9e8   : > { %v1673_v44 = vpop.xlane.xlu0 %1672 }
 0x9e9   : > { %v1677_v46 = vmul.f32 0.015625, %v1673_v44  ;;  %v1680_v47 = vmul.f32 %v1668_v15, %v1668_v15  ;;  %v1686_v56 = vsub.f32 %v3314_v24, %v1668_v15 }
 0x9ea   : > { %v1708_v14 = vpop.permute.xlu1 %1707 }
 0x9eb   : > { %v1681_v16 = vsub.f32 %v1677_v46, %v1679_v45 }
 0x9ec   : > { %v1676_v19 = vpop.xlane.xlu0 %1675 }
 0x9ed   : > { %v1683_v48 = vmax.f32 %v1681_v16, 0.0  ;;  %v1678_v49 = vmul.f32 0.015625, %v1676_v19 }
 0x9ee   : > { %v1713_v6 = vpop.permute.xlu1 %1712 }
 0x9ef   : > { %v1687_v50 = vadd.f32 1e-05, %v1683_v48  ;;  %v1682_v51 = vsub.f32 %v1678_v49, %v1680_v47  ;;  %v2585_v48 = vld [vmem:[%s3487_s14 + $0x4] ss:$8 sps:$4 sm:$0xff]  }
 0x9f0   : > { %2297 = vmatprep.mubr.msk.bf16.mxu1 %vm559_vm0, %v2585_v48 }
 0x9f1   : > { %2613 = vrsqrt.f32 %v1687_v50  ;;  %v1684_v12 = vmax.f32 %v1682_v51, 0.0 }
 0x9f3   : > { %v1688_v52 = vadd.f32 1e-05, %v1684_v12 }
 0x9f4   : > { %v1701_v0 = vpop.permute.xlu0 %1700 }
 0x9f5   : > { %2615 = vrsqrt.f32 %v1688_v52 }
 0x9f8   : > { %v1927_v35 = vpop.permute.xlu0 %1926 }
 0x9fb   : > { %v2614_v54 = vpop.eup %2613 }
 0x9fc   : > { %v1691_v55 = vmul.f32 %v2614_v54, %v1685_v53  ;;  %v1975_v41 = vpop.permute.xlu0 %1974 }
 0x9fe   : > { %v1703_v58 = vmul.f32 %v1696_v42, %v1691_v55 }
 0x9ff   : > { %v2616_v11 = vpop.eup %2615 }
 0xa00   : > { %v1715_v59 = vadd.f32 %v1708_v14, %v1703_v58  ;;  %v1692_v63 = vmul.f32 %v2616_v11, %v1686_v56  ;;  %v2008_v45 = vpop.permute.xlu0 %2007 }
 0xa02   : > { %v1717_v2 = vsub.f32 0.0, %v1715_v59  ;;  %v1704_v4 = vmul.f32 %v1701_v0, %v1692_v63 }
 0xa04   : > { %v1719_v7 = vmul.f32 1.442695, %v1717_v2  ;;  %v1716_v9 = vadd.f32 %v1713_v6, %v1704_v4 }
 0xa06   : > { %2617 = vpow2.f32 %v1719_v7  ;;  %v1718_v17 = vsub.f32 0.0, %v1716_v9 }
 0xa08   : > { %v1721_v20 = vmul.f32 1.442695, %v1718_v17 }
 0xa0a   : > { %2619 = vpow2.f32 %v1721_v20 }
 0xa10   : > { %v2618_v18 = vpop.eup %2617 }
 0xa11   : > { %v1723_v22 = vadd.f32 1.0, %v2618_v18 }
 0xa13   : > { %2621 = vrcp.f32 %v1723_v22 }
 0xa14   : > { %v2620_v23 = vpop.eup %2619 }
 0xa15   : > { %v1724_v25 = vadd.f32 1.0, %v2620_v23 }
 0xa17   : > { %2623 = vrcp.f32 %v1724_v25 }
 0xa1d   : > { %v2622_v24 = vpop.eup %2621 }
 0xa1e   : > { %v1729_v60 = vmul.f32 12.0, %v2622_v24 }
 0xa20   : > { %v1731_v26 = vmul.f32 1.442695, %v1729_v60 }
 0xa21   : > { %v2624_v13 = vpop.eup %2623 }
 0xa22   : > { %2625 = vpow2.f32 %v1731_v26  ;;  %v1730_v27 = vmul.f32 12.0, %v2624_v13 }
 0xa24   : > { %v1733_v61 = vmul.f32 1.442695, %v1730_v27 }
 0xa26   : > { %2627 = vpow2.f32 %v1733_v61 }
 0xa2c   : > { %v2626_v28 = vpop.eup %2625 }
 0xa2d   : > { %v1735_v62 = vmul.f32 %v2626_v28, %v3221_v10 }
 0xa2f   : > { %2429 = vmatprep.mubr.msk.f32.mxu0 %vm1261_vm3, %v1735_v62 }
 0xa30   : > { %v2628_v1 = vpop.eup %2627 }
 0xa31   : > { %v1736_v29 = vmul.f32 %v2628_v1, %v3227_v21 }
 0xa33   : > { %2430 = vmatmul.mubr.msk.f32.vlgmr.msra.gmra.mrb[10].mxu0 %vm1261_vm3, %v1736_v29 }
 0xa34   : > { %2534 = vmatpush3.bf16.msra.mxu0 %v3337_v30  ;;  %2448 = vmatprep.mubr.msk.f32.mxu0 %vm1261_vm3, %v2626_v28 }
 0xa35   : > { %2536 = vmatprep.subr.bf16.mxu0 %v3347_v8 }
 0xa38   : > { %2538 = vmatpush3.bf16.msra.mxu0 %v3347_v8 }
 0xa39   : > { %2540 = vmatprep.subr.bf16.mxu0 %v3359_v36 }
 0xa3c   : > { %2542 = vmatpush3.bf16.msra.mxu0 %v3359_v36 }
 0xa3d   : > { %2544 = vmatprep.subr.bf16.mxu0 %v3366_v38 }
 0xa40   : > { %2546 = vmatpush3.bf16.msra.mxu0 %v3366_v38  ;;  %v1959_v38 = vpop.permute.xlu1 %1958 }
 0xa43   : > { %2449 = vmatmul.mubr.msk.f32.vlgmr.msra.gmra.mrb[16].mxu0 %vm1261_vm3, %v2628_v1  ;;  %vm2020_vm3 = vcmask 105472  }
 0xa44   : > { %v1993_v43 = vpop.permute.xlu1 %1992 }
 0xa48   : > { %v2033_v16 = vpop.permute.xlu1 %2032 }
 0xb06   : > { %v2431_v10 = vpop.f32.mrb[10].mxu0 }
 0xb07   : > { %v1809_v21 = vpop.f32.mrb[11].mxu0 }
 0xb16   : > { %v2450_v31 = vpop.f32.mrb[16].mxu0 }
 0xb17   : > { %2629 = vrcp.f32 %v2450_v31  ;;  %v1890_v30 = vpop.f32.mrb[17].mxu0 }
 0xb18   : > { %2631 = vrcp.f32 %v1890_v30 }
 0xb21   : > { %v2630_v32 = vpop.eup %2629 }
 0xb22   : > { %v2632_v33 = vpop.eup %2631  ;;  %v1902_v34 = vmul.f32 %v2630_v32, %v2431_v10 }
 0xb23   : > { %v1901_v8 = vmul.f32 %v2632_v33, %v1809_v21 }
 0xb24   : > { %1991 = vst.msk [vmem:[#allocation6 + $0x48] sm:$0xff] %vm559_vm0, %v1902_v34  ;;  %v1930_v36 = vmul.f32 %v1927_v35, %v1902_v34  ;;  %v1962_v39 = vmul.f32 %v1959_v38, %v1902_v34  ;;  %v1978_v42 = vmul.f32 %v1975_v41, %v1902_v34  ;;  %v1996_v5 = vmul.f32 %v1993_v43, %v1902_v34 }
 0xb25   : > { %1990 = vst.msk [vmem:[#allocation6 + $0x40] sm:$0xff] %vm559_vm0, %v1901_v8  ;;  %v1929_v37 = vmul.f32 %v1927_v35, %v1901_v8  ;;  %v1961_v40 = vmul.f32 %v1959_v38, %v1901_v8  ;;  %v1977_v3 = vmul.f32 %v1975_v41, %v1901_v8  ;;  %v1995_v44 = vmul.f32 %v1993_v43, %v1901_v8  ;;  %v2588_v35 = vld [vmem:[%s3487_s14 + $0x14] ss:$8 sps:$4 sm:$0xff]  }
 0xb26   : > { %1935 = vrot.lane.b32.xlu1 %v1930_v36, %s2669_s27  ;;  %v2011_v15 = vmul.f32 %v2008_v45, %v1902_v34  ;;  %v2010_v46 = vmul.f32 %v2008_v45, %v1901_v8  ;;  %v2036_v19 = vmul.f32 %v2033_v16, %v1902_v34  ;;  %v2035_v47 = vmul.f32 %v2033_v16, %v1901_v8  ;;  %v2590_v36 = vld [vmem:[%s3487_s14 + $0x10] ss:$8 sps:$4 sm:$0xff]  }
 0xb27   : > { %1933 = vrot.lane.b32.xlu0 %v1929_v37, %s2669_s27 }
 0xb2a   : > { %1946 = vrot.lane.b32.xlu1 %v1902_v34, %s2670_s29 }
 0xb2b   : > { %1944 = vrot.lane.b32.xlu0 %v1901_v8, %s2670_s29  ;;  %v2057_v25 = vld [vmem:[#allocation6 + $0x48] sm:$0xff] }
 0xb2c   : > { %v2056_v23 = vld [vmem:[#allocation6 + $0x40] sm:$0xff] }
 0xb2d   : > { %v2070_v26 = vpack.c.bf16 %v2057_v25, %v2056_v23 }
 0xb2e   : > { %1967 = vrot.lane.b32.xlu1 %v1962_v39, %s2668_s26 }
 0xb2f   : > { %1965 = vrot.lane.b32.xlu0 %v1961_v40, %s2668_s26 }
 0xb32   : > { %1983 = vrot.lane.b32.xlu1 %v1978_v42, %s2651_s28 }
 0xb33   : > { %1981 = vrot.lane.b32.xlu0 %v1977_v3, %s2651_s28 }
 0xb36   : > { %2001 = vrot.lane.b32.xlu1 %v1996_v5, %s2649_s23 }
 0xb37   : > { %1999 = vrot.lane.b32.xlu0 %v1995_v44, %s2649_s23 }
 0xb3a   : > { %2016 = vrot.lane.b32.xlu1 %v2011_v15, %s2667_s25 }
 0xb3b   : > { %2014 = vrot.lane.b32.xlu0 %v2010_v46, %s2667_s25  ;;  %s2302_s25 = sshll.u32 %s3490_s19, 5 }
 0xb3c   : > { %s494_s29 = scalar_lea.vmem %s3488_s15, %s2302_s25 }
 0xb3e   : > { %2025 = vrot.lane.b32.xlu1 %v1902_v34, %s2671_s30 }
 0xb3f   : > { %2023 = vrot.lane.b32.xlu0 %v1901_v8, %s2671_s30  ;;  %v2587_v8 = vld [vmem:[%s3487_s14] ss:$8 sps:$4 sm:$0xff]  }
 0xb42   : > { %2041 = vrot.lane.b32.xlu1 %v2036_v19, %s2666_s24 }
 0xb43   : > { %2039 = vrot.lane.b32.xlu0 %v2035_v47, %s2666_s24 }
 0xb98   : > { %v1936_v49 = vpop.permute.xlu1 %1935 }
 0xb99   : > { %1941 = vst.msk [vmem:[#allocation6 + $0x8] sm:$0xff] %vm1939_vm12, %v1936_v49  ;;  %v1934_v50 = vpop.permute.xlu0 %1933 }
 0xb9a   : > { %1940 = vst.msk [vmem:[#allocation6] sm:$0xff] %vm1939_vm12, %v1934_v50 }
 0xb9c   : > { %v1947_v51 = vpop.permute.xlu1 %1946 }
 0xb9d   : > { %1952 = vst.msk [vmem:[#allocation6 + $0x18] sm:$0xff] %vm1950_vm13, %v1947_v51  ;;  %v1945_v12 = vpop.permute.xlu0 %1944 }
 0xb9e   : > { %1951 = vst.msk [vmem:[#allocation6 + $0x10] sm:$0xff] %vm1950_vm13, %v1945_v12 }
 0xba0   : > { %v1968_v52 = vpop.permute.xlu1 %1967  ;;  %v2049_v53 = vld [vmem:[#allocation6 + $0x8] sm:$0xff] }
 0xba1   : > { %1973 = vst.msk [vmem:[#allocation6 + $0x28] sm:$0xff] %vm1971_vm1, %v1968_v52  ;;  %v1966_v54 = vpop.permute.xlu0 %1965  ;;  %v2048_v55 = vld [vmem:[#allocation6] sm:$0xff] }
 0xba2   : > { %1972 = vst.msk [vmem:[#allocation6 + $0x20] sm:$0xff] %vm1971_vm1, %v1966_v54  ;;  %v2066_v14 = vpack.c.bf16 %v2049_v53, %v2048_v55 }
 0xba4   : > { %v1984_v56 = vpop.permute.xlu1 %1983  ;;  %2100 = vmatpush1.bf16.msra.mxu1 %v2066_v14  ;;  %v2051_v58 = vld [vmem:[#allocation6 + $0x18] sm:$0xff] }
 0xba5   : > { %1989 = vst.msk [vmem:[#allocation6 + $0x38] sm:$0xff] %vm1987_vm2, %v1984_v56  ;;  %v1982_v11 = vpop.permute.xlu0 %1981  ;;  %2101 = vmatprep.subr.bf16.mxu1 %v2658_v57  ;;  %v2050_v59 = vld [vmem:[#allocation6 + $0x10] sm:$0xff] }
 0xba6   : > { %1988 = vst.msk [vmem:[#allocation6 + $0x30] sm:$0xff] %vm1987_vm2, %v1982_v11  ;;  %v2067_v63 = vpack.c.bf16 %v2051_v58, %v2050_v59 }
 0xba8   : > { %v2002_v0 = vpop.permute.xlu1 %2001  ;;  %2102 = vmatpush1.bf16.msra.mxu1 %v2067_v63  ;;  %v2053_v2 = vld [vmem:[#allocation6 + $0x28] sm:$0xff] }
 0xba9   : > { %2006 = vst.msk [vmem:[#allocation6 + $0x58] sm:$0xff] %vm600_vm5, %v2002_v0  ;;  %v2000_v4 = vpop.permute.xlu0 %1999  ;;  %2103 = vmatprep.subr.bf16.mxu1 %v2658_v57  ;;  %v2052_v6 = vld [vmem:[#allocation6 + $0x20] sm:$0xff] }
 0xbaa   : > { %2005 = vst.msk [vmem:[#allocation6 + $0x50] sm:$0xff] %vm600_vm5, %v2000_v4  ;;  %v2068_v7 = vpack.c.bf16 %v2053_v2, %v2052_v6  ;;  %vm2045_vm5 = vcmask 89088  }
 0xbac   : > { %v2017_v9 = vpop.permute.xlu1 %2016  ;;  %2104 = vmatpush1.bf16.msra.mxu1 %v2068_v7  ;;  %v2055_v17 = vld [vmem:[#allocation6 + $0x38] sm:$0xff] }
 0xbad   : > { %2022 = vst.msk [vmem:[#allocation6 + $0x68] sm:$0xff] %vm2020_vm3, %v2017_v9  ;;  %v2015_v20 = vpop.permute.xlu0 %2014  ;;  %2105 = vmatprep.subr.bf16.mxu1 %v2658_v57  ;;  %v2054_v18 = vld [vmem:[#allocation6 + $0x30] sm:$0xff] }
 0xbae   : > { %2021 = vst.msk [vmem:[#allocation6 + $0x60] sm:$0xff] %vm2020_vm3, %v2015_v20  ;;  %v2069_v22 = vpack.c.bf16 %v2055_v17, %v2054_v18 }
 0xbb0   : > { %v2026_v24 = vpop.permute.xlu1 %2025  ;;  %2106 = vmatpush1.bf16.msra.mxu1 %v2069_v22  ;;  %v2059_v27 = vld [vmem:[#allocation6 + $0x58] sm:$0xff] }
 0xbb1   : > { %2031 = vst.msk [vmem:[#allocation6 + $0x78] sm:$0xff] %vm2029_vm4, %v2026_v24  ;;  %v2024_v60 = vpop.permute.xlu0 %2023  ;;  %2107 = vmatprep.subr.bf16.mxu1 %v2658_v57  ;;  %v2058_v13 = vld [vmem:[#allocation6 + $0x50] sm:$0xff] }
 0xbb2   : > { %2030 = vst.msk [vmem:[#allocation6 + $0x70] sm:$0xff] %vm2029_vm4, %v2024_v60  ;;  %v2071_v62 = vpack.c.bf16 %v2059_v27, %v2058_v13 }
 0xbb4   : > { %v2042_v61 = vpop.permute.xlu1 %2041  ;;  %2108 = vmatpush1.bf16.msra.mxu1 %v2070_v26  ;;  %v2061_v29 = vld [vmem:[#allocation6 + $0x68] sm:$0xff] }
 0xbb5   : > { %2047 = vst.msk [vmem:[#allocation6 + $0x88] sm:$0xff] %vm2045_vm5, %v2042_v61  ;;  %v2040_v28 = vpop.permute.xlu0 %2039  ;;  %2109 = vmatprep.subr.bf16.mxu1 %v2658_v57  ;;  %v2060_v1 = vld [vmem:[#allocation6 + $0x60] sm:$0xff] }
 0xbb6   : > { %2046 = vst.msk [vmem:[#allocation6 + $0x80] sm:$0xff] %vm2045_vm5, %v2040_v28  ;;  %v2072_v10 = vpack.c.bf16 %v2061_v29, %v2060_v1 }
 0xbb8   : > { %2110 = vmatpush1.bf16.msra.mxu1 %v2071_v62  ;;  %v2063_v31 = vld [vmem:[#allocation6 + $0x78] sm:$0xff] }
 0xbb9   : > { %2111 = vmatprep.subr.bf16.mxu1 %v2658_v57  ;;  %v2062_v21 = vld [vmem:[#allocation6 + $0x70] sm:$0xff] }
 0xbba   : > { %v2073_v30 = vpack.c.bf16 %v2063_v31, %v2062_v21 }
 0xbbc   : > { %2112 = vmatpush1.bf16.msra.mxu1 %v2072_v10  ;;  %v2065_v33 = vld [vmem:[#allocation6 + $0x88] sm:$0xff] }
 0xbbd   : > { %2113 = vmatprep.subr.bf16.mxu1 %v2658_v57  ;;  %v2064_v32 = vld [vmem:[#allocation6 + $0x80] sm:$0xff] }
 0xbbe   : > { %v2074_v34 = vpack.c.bf16 %v2065_v33, %v2064_v32 }
 0xbc0   : > { %2114 = vmatpush1.bf16.msra.mxu1 %v2073_v30 }
 0xbc1   : > { %2115 = vmatprep.subr.bf16.mxu1 %v2658_v57 }
 0xbc4   : > { %2116 = vmatpush1.bf16.msra.mxu1 %v2074_v34 }
 0xbc7   : > { %2132 = vmatmul.mubr.bf16.vlgmr.msra.gmra.mrb[8].mxu1 %v2587_v8 }
 0xbc8   : > { %2298 = vmatprep.mubr.msk.bf16.mxu1 %vm559_vm0, %v2588_v35 }
 0xbcf   : > { %2140 = vmatmul.mubr.bf16.gmra.mrb[12].mxu1 %v2590_v36 }
 0xc9a   : > { %v3436_v37 = vpop.f32.mrb[8].mxu1 }
 0xc9b   : > { %v2135_v57 = vpop.f32.mrb[9].mxu1  ;;  %v2148_v38 = vsel %vm559_vm0, %v3436_v37, 0.0  ;;  %v2164_v40 = vmul.f32 %v3436_v37, %v3436_v37 }
 0xc9c   : > { %2149 = vadd.xlane.f32.xlu0 %v2148_v38  ;;  %v3440_v39 = vpop.f32.mrb[10].mxu1 }
 0xc9d   : > { %v2165_v41 = vmul.f32 %v3440_v39, %v3440_v39  ;;  %v2138_v42 = vpop.f32.mrb[11].mxu1  ;;  %v2151_v3 = vsel %vm559_vm0, %v3440_v39, 0.0  ;;  %v2168_v5 = vsel %vm559_vm0, %v2164_v40, 0.0 }
 0xc9e   : > { %2152 = vadd.xlane.f32.xlu1 %v2151_v3 }
 0xc9f   : > { %v2171_v43 = vsel %vm559_vm0, %v2165_v41, 0.0 }
 0xca0   : > { %2172 = vadd.xlane.f32.xlu0 %v2171_v43 }
 0xca2   : > { %2169 = vadd.xlane.f32.xlu1 %v2168_v5  ;;  %v3450_v44 = vpop.f32.mrb[12].mxu1 }
 0xca3   : > { %v2166_v45 = vmul.f32 %v3450_v44, %v3450_v44  ;;  %v2143_v15 = vpop.f32.mrb[13].mxu1  ;;  %v2154_v46 = vsel %vm559_vm0, %v3450_v44, 0.0 }
 0xca4   : > { %2155 = vadd.xlane.f32.xlu0 %v2154_v46  ;;  %v2144_v16 = vpop.f32.mrb[14].mxu1 }
 0xca5   : > { %v2146_v19 = vpop.f32.mrb[15].mxu1  ;;  %v2174_v47 = vsel %vm559_vm0, %v2166_v45, 0.0  ;;  %v2167_v48 = vmul.f32 %v2144_v16, %v2144_v16  ;;  %v2157_v49 = vsel %vm559_vm0, %v2144_v16, 0.0 }
 0xca6   : > { %2175 = vadd.xlane.f32.xlu1 %v2174_v47 }
 0xca7   : > { %v2177_v50 = vsel %vm559_vm0, %v2167_v48, 0.0 }
 0xca8   : > { %2158 = vadd.xlane.f32.xlu0 %v2157_v49 }
 0xcac   : > { %2178 = vadd.xlane.f32.xlu0 %v2177_v50 }
 0xd29   : > { %v2150_v51 = vpop.xlane.xlu0 %2149 }
 0xd2a   : > { %v2160_v52 = vmul.f32 0.0625, %v2150_v51 }
 0xd2b   : > { %v2153_v12 = vpop.xlane.xlu1 %2152 }
 0xd2c   : > { %v2161_v53 = vmul.f32 0.0625, %v2153_v12  ;;  %v2184_v58 = vmul.f32 %v2160_v52, %v2160_v52  ;;  %v2196_v10 = vsub.f32 %v3436_v37, %v2160_v52 }
 0xd2d   : > { %v2173_v54 = vpop.xlane.xlu0 %2172 }
 0xd2e   : > { %v2185_v55 = vmul.f32 %v2161_v53, %v2161_v53  ;;  %v2181_v14 = vmul.f32 0.0625, %v2173_v54  ;;  %v2197_v62 = vsub.f32 %v3440_v39, %v2161_v53 }
 0xd2f   : > { %v2170_v56 = vpop.xlane.xlu1 %2169 }
 0xd30   : > { %v2189_v11 = vsub.f32 %v2181_v14, %v2185_v55  ;;  %v2180_v59 = vmul.f32 0.0625, %v2170_v56 }
 0xd31   : > { %v2156_v63 = vpop.xlane.xlu0 %2155 }
 0xd32   : > { %v2193_v0 = vmax.f32 %v2189_v11, 0.0  ;;  %v2188_v2 = vsub.f32 %v2180_v59, %v2184_v58  ;;  %v2162_v4 = vmul.f32 0.0625, %v2156_v63 }
 0xd33   : > { %v2176_v6 = vpop.xlane.xlu1 %2175 }
 0xd34   : > { %v2201_v7 = vadd.f32 1e-05, %v2193_v0  ;;  %v2192_v9 = vmax.f32 %v2188_v2, 0.0  ;;  %v2186_v17 = vmul.f32 %v2162_v4, %v2162_v4  ;;  %v2182_v20 = vmul.f32 0.0625, %v2176_v6 }
 0xd35   : > { %v2159_v18 = vpop.xlane.xlu0 %2158  ;;  %v2198_v32 = vsub.f32 %v3450_v44, %v2162_v4 }
 0xd36   : > { %2633 = vrsqrt.f32 %v2201_v7  ;;  %v2200_v22 = vadd.f32 1e-05, %v2192_v9  ;;  %v2163_v23 = vmul.f32 0.0625, %v2159_v18  ;;  %v2190_v25 = vsub.f32 %v2182_v20, %v2186_v17 }
 0xd38   : > { %2635 = vrsqrt.f32 %v2200_v22  ;;  %v2194_v24 = vmax.f32 %v2190_v25, 0.0  ;;  %v2187_v26 = vmul.f32 %v2163_v23, %v2163_v23  ;;  %v2199_v8 = vsub.f32 %v2144_v16, %v2163_v23 }
 0xd39   : > { %v2179_v60 = vpop.xlane.xlu0 %2178 }
 0xd3a   : > { %v2183_v13 = vmul.f32 0.0625, %v2179_v60  ;;  %v2202_v27 = vadd.f32 1e-05, %v2194_v24 }
 0xd3c   : > { %v2191_v61 = vsub.f32 %v2183_v13, %v2187_v26  ;;  %2637 = vrsqrt.f32 %v2202_v27 }
 0xd3e   : > { %v2195_v28 = vmax.f32 %v2191_v61, 0.0 }
 0xd40   : > { %v2634_v1 = vpop.eup %2633  ;;  %v2203_v29 = vadd.f32 1e-05, %v2195_v28 }
 0xd41   : > { %v2209_v21 = vmul.f32 %v2634_v1, %v2197_v62 }
 0xd42   : > { %v2636_v31 = vpop.eup %2635  ;;  %2639 = vrsqrt.f32 %v2203_v29 }
 0xd43   : > { %2213 = vst.msk [vmem:[%s494_s29 + $0x8] sm:$0xff] %vm559_vm0, %v2209_v21  ;;  %v2208_v30 = vmul.f32 %v2636_v31, %v2196_v10 }
 0xd45   : > { %2212 = vst.msk [vmem:[%s494_s29] sm:$0xff] %vm559_vm0, %v2208_v30 }
 0xd46   : > { %v2638_v33 = vpop.eup %2637 }
 0xd47   : > { %v2210_v34 = vmul.f32 %v2638_v33, %v2198_v32 }
 0xd49   : > { %2214 = vst.msk [vmem:[%s494_s29 + $0x10] sm:$0xff] %vm559_vm0, %v2210_v34 }
 0xd4c   : > { %v2640_v35 = vpop.eup %2639 }
 0xd4d   : > { %v2211_v36 = vmul.f32 %v2640_v35, %v2199_v8 }
 0xd4f   : > { %2215 = vst.msk [vmem:[%s494_s29 + $0x18] sm:$0xff] %vm559_vm0, %v2211_v36 }
 0xd50 PF: > { %s25_s18 = sadd.s32 1, %s2647_s18  }
 0xd51   : > { %p22_p4 = scmp.ge.s32.totalorder %s25_s18, 4  }
 0xd53   :  { %24 = sbr.rel (!%p22_p4) target bundleno = 1 (0x1), region = 110 }

</bundles_post_ra>
